<compile_context>
chip_gen: v5e
topology: v5e:2x2
jax: 0.10.0
libtpu: 0.0.40
codegen_flags: <defaults>
</compile_context>

<pallas_src>
import collections
import functools

import jax
import jax.numpy as jnp
from jax.experimental import pallas as pl
from jax.experimental.pallas import tpu as pltpu


CLIPConfig = collections.namedtuple(
    "CLIPConfig",
    ["hidden", "inter", "heads", "layers", "proj",
     "image_size", "patch", "channels", "vocab", "max_pos"])


# ----------------------------- kernel helpers -------------------------------

def _layer_norm(x, g, b, eps=1e-5):
    mu = jnp.mean(x, axis=-1, keepdims=True)
    var = jnp.mean((x - mu) ** 2, axis=-1, keepdims=True)
    return (x - mu) * jax.lax.rsqrt(var + eps) * g + b


def _encoder_layer(x, mask, qkv_w, qkv_b, o_w, o_b,
                   ln1_g, ln1_b, ln2_g, ln2_b,
                   fc1_w, fc1_b, fc2_w, fc2_b, *, heads):
    """One CLIP encoder layer (pre-LN, quick_gelu MLP) on a (S, H) f32 block.

    Weight matrices are bf16 (MXU operands); elementwise math stays f32.
    """
    S, H = x.shape
    Dh = H // heads
    scale = Dh ** -0.5

    # ---- LN1 + fused QKV projection (single MXU pass) ----
    h = _layer_norm(x, ln1_g, ln1_b).astype(jnp.bfloat16)
    qkv = jnp.dot(h, qkv_w, preferred_element_type=jnp.float32) + qkv_b  # (S,3H)
    q = qkv[:, 0 * H:1 * H] * scale          # fold 1/sqrt(Dh) into q once
    k = qkv[:, 1 * H:2 * H]
    v = qkv[:, 2 * H:3 * H]

    # ---- all heads in one batched contraction: (heads, S, Dh) ----
    def split_heads(t):
        return jnp.concatenate(
            [t[:, hd * Dh:(hd + 1) * Dh][None] for hd in range(heads)], axis=0)

    qh, kh, vh = split_heads(q), split_heads(k), split_heads(v)
    s = jnp.einsum("hqd,hkd->hqk", qh, kh,
                   preferred_element_type=jnp.float32)            # (heads,S,S)
    if mask is not None:
        s = s + mask                                              # (S,S) broadcast
    s = s - jnp.max(s, axis=-1, keepdims=True)
    p = jnp.exp(s)
    p = p * pl.reciprocal(jnp.sum(p, axis=-1, keepdims=True), approx=True)
    o = jnp.einsum("hqk,hkd->hqd", p, vh,
                   preferred_element_type=jnp.float32)            # (heads,S,Dh)

    # merge heads back to (S, H) and do ONE full-width O-projection
    attn = jnp.concatenate([o[hd] for hd in range(heads)], axis=-1)
    x = x + jnp.dot(attn.astype(jnp.bfloat16), o_w,
                    preferred_element_type=jnp.float32) + o_b

    # ---- LN2 + MLP (quick_gelu) + residual ----
    h = _layer_norm(x, ln2_g, ln2_b).astype(jnp.bfloat16)
    h = jnp.dot(h, fc1_w, preferred_element_type=jnp.float32) + fc1_b
    h = h * jax.nn.sigmoid(1.702 * h)                             # quick_gelu (f32)
    x = x + jnp.dot(h.astype(jnp.bfloat16), fc2_w,
                    preferred_element_type=jnp.float32) + fc2_b
    return x


# ----------------------------- tower kernels --------------------------------

def _vision_tower_kernel(patches_ref, patch_w_ref, pos_cls_ref,
                         pre_g_ref, pre_b_ref,
                         qkv_w_ref, qkv_b_ref, o_w_ref, o_b_ref,
                         ln1_g_ref, ln1_b_ref, ln2_g_ref, ln2_b_ref,
                         fc1_w_ref, fc1_b_ref, fc2_w_ref, fc2_b_ref,
                         post_g_ref, post_b_ref, vproj_ref,
                         out_ref, *, heads, layers):
    """Whole CLIPVisionTransformer for one image (grid step = one image)."""
    # Patch Conv2d (bias=False) as a matmul; row 0 is an all-zero "patch" whose
    # embedding (the class embedding) is folded into pos_cls row 0.
    x = jnp.dot(patches_ref[0], patch_w_ref[...],
                preferred_element_type=jnp.float32) + pos_cls_ref[...]   # (S, H)
    x = _layer_norm(x, pre_g_ref[...], pre_b_ref[...])                   # pre_layrnorm

    for l in range(layers):        # tiny static loop -> fully unrolled in-kernel
        x = _encoder_layer(
            x, None,
            qkv_w_ref[l], qkv_b_ref[l], o_w_ref[l], o_b_ref[l],
            ln1_g_ref[l], ln1_b_ref[l], ln2_g_ref[l], ln2_b_ref[l],
            fc1_w_ref[l], fc1_b_ref[l], fc2_w_ref[l], fc2_b_ref[l],
            heads=heads)

    pooled = _layer_norm(x[0:1, :], post_g_ref[...], post_b_ref[...])    # CLS token
    out_ref[0] = jnp.dot(pooled.astype(jnp.bfloat16), vproj_ref[...],
                         preferred_element_type=jnp.float32)


def _text_tower_kernel(x0_ref, mask_ref, sel_ref,
                       qkv_w_ref, qkv_b_ref, o_w_ref, o_b_ref,
                       ln1_g_ref, ln1_b_ref, ln2_g_ref, ln2_b_ref,
                       fc1_w_ref, fc1_b_ref, fc2_w_ref, fc2_b_ref,
                       fin_g_ref, fin_b_ref, tproj_ref,
                       out_ref, *, heads, layers):
    """Whole CLIPTextTransformer for one sequence (grid step = one text)."""
    x = x0_ref[0]                    # (S, H) token + position embeddings
    mask = mask_ref[0]               # (S, S) causal + padding additive mask

    for l in range(layers):
        x = _encoder_layer(
            x, mask,
            qkv_w_ref[l], qkv_b_ref[l], o_w_ref[l], o_b_ref[l],
            ln1_g_ref[l], ln1_b_ref[l], ln2_g_ref[l], ln2_b_ref[l],
            fc1_w_ref[l], fc1_b_ref[l], fc2_w_ref[l], fc2_b_ref[l],
            heads=heads)

    # EOT pooling as a one-hot matmul (exact gather); final LN is per-token so
    # gather-then-LN == LN-then-gather.
    pooled = jnp.dot(sel_ref[0], x, preferred_element_type=jnp.float32)  # (1, H)
    pooled = _layer_norm(pooled, fin_g_ref[...], fin_b_ref[...])
    out_ref[0] = jnp.dot(pooled.astype(jnp.bfloat16), tproj_ref[...],
                         preferred_element_type=jnp.float32)


# ----------------------------- spec helpers ---------------------------------

def _resident(shape):
    """Full-array block with a constant index_map: stays resident in VMEM."""
    n = len(shape)
    return pl.BlockSpec(shape, lambda b, n=n: (0,) * n)


def _layer_specs(L, H, I):
    return [
        _resident((L, H, 3 * H)), _resident((L, 1, 3 * H)),   # qkv_w, qkv_b
        _resident((L, H, H)),     _resident((L, 1, H)),       # o_w,   o_b
        _resident((L, 1, H)),     _resident((L, 1, H)),       # ln1_g, ln1_b
        _resident((L, 1, H)),     _resident((L, 1, H)),       # ln2_g, ln2_b
        _resident((L, H, I)),     _resident((L, 1, I)),       # fc1_w, fc1_b
        _resident((L, I, H)),     _resident((L, 1, H)),       # fc2_w, fc2_b
    ]


def _layer_args(lw):
    return [lw["qkv_w"], lw["qkv_b"], lw["o_w"], lw["o_b"],
            lw["ln1_g"], lw["ln1_b"], lw["ln2_g"], lw["ln2_b"],
            lw["fc1_w"], lw["fc1_b"], lw["fc2_w"], lw["fc2_b"]]


# --------------------------- model towers -----------------------------------

def vision_forward(pixel_values, vp, cfg):
    """CLIPVisionTransformer -> pooled_output -> visual_projection."""
    B, C, Hi, Wi = pixel_values.shape
    P, H, I, L = cfg.patch, cfg.hidden, cfg.inter, cfg.layers
    nP = (Hi // P) * (Wi // P)
    S = nP + 1
    CPP = C * P * P

    # Conv2d(C, H, kernel=P, stride=P, bias=False) == patch flatten + matmul.
    patches = pixel_values.reshape(B, C, Hi // P, P, Wi // P, P)
    patches = patches.transpose(0, 2, 4, 1, 3, 5).reshape(B, nP, CPP)
    # prepend a zero "patch" for the CLS slot (class embedding lives in pos_cls)
    patches = jnp.concatenate(
        [jnp.zeros((B, 1, CPP), patches.dtype), patches], axis=1)
    patches = patches.astype(jnp.bfloat16)                          # (B, S, CPP)

    lw = vp["layers"]
    kern = functools.partial(_vision_tower_kernel, heads=cfg.heads, layers=L)
    out = pl.pallas_call(
        kern,
        grid=(B,),
        in_specs=[pl.BlockSpec((1, S, CPP), lambda b: (b, 0, 0)),
                  _resident((CPP, H)),
                  _resident((S, H)),
                  _resident((1, H)), _resident((1, H))]
                 + _layer_specs(L, H, I)
                 + [_resident((1, H)), _resident((1, H)),
                    _resident((H, cfg.proj))],
        out_specs=pl.BlockSpec((1, 1, cfg.proj), lambda b: (b, 0, 0)),
        out_shape=jax.ShapeDtypeStruct((B, 1, cfg.proj), jnp.float32),
        compiler_params=pltpu.CompilerParams(
            dimension_semantics=("parallel",)),     # v7x: 2nd TensorCore usable
    )(patches, vp["patch_w"], vp["pos_cls"],
      vp["pre_ln_g"], vp["pre_ln_b"],
      *_layer_args(lw),
      vp["post_ln_g"], vp["post_ln_b"], vp["visual_proj"])
    return out.reshape(B, cfg.proj)


def text_forward(input_ids, attention_mask, tp, cfg):
    """CLIPTextTransformer -> pooled_output (eot token) -> text_projection."""
    B, S = input_ids.shape
    H, I, L = cfg.hidden, cfg.inter, cfg.layers

    # embedding gather left to XLA (data-dependent, tiny)
    x0 = tp["tok_emb"][input_ids] + tp["pos_emb"][None, :S, :]      # (B, S, H)

    causal = jnp.triu(jnp.full((S, S), -1e9, jnp.float32), k=1)
    pad = (1.0 - attention_mask.astype(jnp.float32)) * -1e9         # key-axis mask
    mask = causal[None, :, :] + pad[:, None, :]                     # (B, S, S)

    # CLIP pooling rule (EOT == argmax token id in this synthetic setup).
    # TODO(synk): real HF tokenizer uses the eos_token_id position, not argmax.
    eot_idx = jnp.argmax(input_ids, axis=-1)
    sel = jax.nn.one_hot(eot_idx, S, dtype=jnp.float32).reshape(B, 1, S)

    lw = tp["layers"]
    kern = functools.partial(_text_tower_kernel, heads=cfg.heads, layers=L)
    out = pl.pallas_call(
        kern,
        grid=(B,),
        in_specs=[pl.BlockSpec((1, S, H), lambda b: (b, 0, 0)),
                  pl.BlockSpec((1, S, S), lambda b: (b, 0, 0)),
                  pl.BlockSpec((1, 1, S), lambda b: (b, 0, 0))]
                 + _layer_specs(L, H, I)
                 + [_resident((1, H)), _resident((1, H)),
                    _resident((H, cfg.proj))],
        out_specs=pl.BlockSpec((1, 1, cfg.proj), lambda b: (b, 0, 0)),
        out_shape=jax.ShapeDtypeStruct((B, 1, cfg.proj), jnp.float32),
        compiler_params=pltpu.CompilerParams(
            dimension_semantics=("parallel",)),
    )(x0, mask, sel, *_layer_args(lw),
      tp["final_ln_g"], tp["final_ln_b"], tp["text_proj"])
    return out.reshape(B, cfg.proj)


_vision_forward_jit = jax.jit(vision_forward, static_argnums=(2,))
_text_forward_jit = jax.jit(text_forward, static_argnums=(3,))


def clip_forward(features, params, cfg):
    """Mirrors CLIPModel.forward: builds features['embedding']."""
    image_embeds = None
    text_embeds = None
    if "pixel_values" in features:
        image_embeds = _vision_forward_jit(features["pixel_values"],
                                           params["vision"], cfg)
    if "input_ids" in features:
        attn = features.get("attention_mask",
                            jnp.ones_like(features["input_ids"]))
        text_embeds = _text_forward_jit(features["input_ids"], attn,
                                        params["text"], cfg)

    sentence_embedding = []
    img_i, txt_i = 0, 0
    for input_type in features["image_text_info"]:
        if input_type == 0:
            sentence_embedding.append(image_embeds[img_i]); img_i += 1
        else:
            sentence_embedding.append(text_embeds[txt_i]); txt_i += 1
    features["embedding"] = jnp.stack(sentence_embedding).astype(jnp.float32)
    return features


# ------------------------------ param init ---------------------------------

def _init_encoder_layer(key, hidden, inter):
    ks = jax.random.split(key, 4)
    std = 0.02
    return {
        "ln1_g": jnp.ones((hidden,), jnp.float32),
        "ln1_b": jnp.zeros((hidden,), jnp.float32),
        "qkv_w": jax.random.normal(ks[0], (hidden, 3 * hidden), jnp.float32) * std,
        "qkv_b": jnp.zeros((3 * hidden,), jnp.float32),
        "o_w": jax.random.normal(ks[1], (hidden, hidden), jnp.float32) * std,
        "o_b": jnp.zeros((hidden,), jnp.float32),
        "ln2_g": jnp.ones((hidden,), jnp.float32),
        "ln2_b": jnp.zeros((hidden,), jnp.float32),
        "fc1_w": jax.random.normal(ks[2], (hidden, inter), jnp.float32) * std,
        "fc1_b": jnp.zeros((inter,), jnp.float32),
        "fc2_w": jax.random.normal(ks[3], (inter, hidden), jnp.float32) * std,
        "fc2_b": jnp.zeros((hidden,), jnp.float32),
    }


def init_params(key, cfg):
    H, I, P, C = cfg.hidden, cfg.inter, cfg.patch, cfg.channels
    nP = (cfg.image_size // P) ** 2
    kv, kt = jax.random.split(key)
    kvs = jax.random.split(kv, 4 + cfg.layers)
    kts = jax.random.split(kt, 4 + cfg.layers)
    std = 0.02
    vision = {
        "patch_w": jax.random.normal(kvs[0], (C * P * P, H), jnp.float32) * std,
        "class_emb": jax.random.normal(kvs[1], (H,), jnp.float32) * std,
        "pos_emb": jax.random.normal(kvs[2], (nP + 1, H), jnp.float32) * std,
        "pre_ln_g": jnp.ones((H,), jnp.float32),
        "pre_ln_b": jnp.zeros((H,), jnp.float32),
        "post_ln_g": jnp.ones((H,), jnp.float32),
        "post_ln_b": jnp.zeros((H,), jnp.float32),
        "visual_proj": jax.random.normal(kvs[3], (H, cfg.proj), jnp.float32) * std,
        "layers": [_init_encoder_layer(kvs[4 + i], H, I) for i in range(cfg.layers)],
    }
    text = {
        "tok_emb": jax.random.normal(kts[0], (cfg.vocab, H), jnp.float32) * std,
        "pos_emb": jax.random.normal(kts[1], (cfg.max_pos, H), jnp.float32) * std,
        "final_ln_g": jnp.ones((H,), jnp.float32),
        "final_ln_b": jnp.zeros((H,), jnp.float32),
        "text_proj": jax.random.normal(kts[2], (H, cfg.proj), jnp.float32) * std,
        "layers": [_init_encoder_layer(kts[4 + i], H, I) for i in range(cfg.layers)],
    }
    return {"vision": vision, "text": text}


def pack_params(params):
    """Stack per-layer weights along a leading layer axis; bf16 MXU operands."""
    def stack_layers(layers):
        L = len(layers)
        H = layers[0]["o_b"].shape[0]
        I = layers[0]["fc1_b"].shape[0]

        def stk(name):
            return jnp.stack([lp[name] for lp in layers], axis=0)

        return {
            "qkv_w": stk("qkv_w").astype(jnp.bfloat16),          # (L, H, 3H)
            "qkv_b": stk("qkv_b").reshape(L, 1, 3 * H),
            "o_w":   stk("o_w").astype(jnp.bfloat16),            # (L, H, H)
            "o_b":   stk("o_b").reshape(L, 1, H),
            "ln1_g": stk("ln1_g").reshape(L, 1, H),
            "ln1_b": stk("ln1_b").reshape(L, 1, H),
            "ln2_g": stk("ln2_g").reshape(L, 1, H),
            "ln2_b": stk("ln2_b").reshape(L, 1, H),
            "fc1_w": stk("fc1_w").astype(jnp.bfloat16),          # (L, H, I)
            "fc1_b": stk("fc1_b").reshape(L, 1, I),
            "fc2_w": stk("fc2_w").astype(jnp.bfloat16),          # (L, I, H)
            "fc2_b": stk("fc2_b").reshape(L, 1, H),
        }

    v, t = params["vision"], params["text"]
    H = v["pre_ln_g"].shape[0]
    vision = {
        "patch_w": v["patch_w"].astype(jnp.bfloat16),
        # class embedding folded into position-embedding row 0 (CLS patch row = 0)
        "pos_cls": v["pos_emb"].at[0].add(v["class_emb"]),
        "pre_ln_g": v["pre_ln_g"].reshape(1, H),
        "pre_ln_b": v["pre_ln_b"].reshape(1, H),
        "post_ln_g": v["post_ln_g"].reshape(1, H),
        "post_ln_b": v["post_ln_b"].reshape(1, H),
        "visual_proj": v["visual_proj"].astype(jnp.bfloat16),
        "layers": stack_layers(v["layers"]),
    }
    text = {
        "tok_emb": t["tok_emb"],
        "pos_emb": t["pos_emb"],
        "final_ln_g": t["final_ln_g"].reshape(1, H),
        "final_ln_b": t["final_ln_b"].reshape(1, H),
        "text_proj": t["text_proj"].astype(jnp.bfloat16),
        "layers": stack_layers(t["layers"]),
    }
    return {"vision": vision, "text": text}


# ---------------------------------- main ------------------------------------

if __name__ == "__main__":
    cfg = CLIPConfig(hidden=32, inter=64, heads=2, layers=2, proj=16,
                     image_size=16, patch=8, channels=3, vocab=64, max_pos=16)

    key = jax.random.PRNGKey(0)
    kp, kimg, ktok = jax.random.split(key, 3)
    params = pack_params(init_params(kp, cfg))

    # 2 images + 2 texts, interleaved as [image, text, image, text]
    pixel_values = jax.random.normal(kimg, (2, 3, 16, 16), jnp.float32)   # NCHW
    input_ids = jax.random.randint(ktok, (2, 8), 1, cfg.vocab - 1)
    # place EOT (= max token id) at the end of each valid sequence
    input_ids = input_ids.at[0, 7].set(cfg.vocab - 1)
    input_ids = input_ids.at[1, 5].set(cfg.vocab - 1)
    attention_mask = jnp.array([[1, 1, 1, 1, 1, 1, 1, 1],
                                [1, 1, 1, 1, 1, 1, 0, 0]], jnp.int32)

    features = {
        "pixel_values": pixel_values,
        "input_ids": input_ids,
        "attention_mask": attention_mask,
        "image_text_info": [0, 1, 0, 1],
    }

    out = clip_forward(features, params, cfg)
    emb = jax.block_until_ready(out["embedding"])
    assert emb.shape == (4, cfg.proj) and emb.dtype == jnp.float32
    assert bool(jnp.all(jnp.isfinite(emb)))
    print("KERNEL_OK")
</pallas_src>

<mosaic_0001>
module attributes {stable_mosaic.version = 11 : i64} {
  func.func @_vision_tower_kernel(%arg0: i32, %arg1: memref<1x5x192xbf16, #tpu.memory_space<vmem>>, %arg2: memref<192x32xbf16, #tpu.memory_space<vmem>>, %arg3: memref<5x32xf32, #tpu.memory_space<vmem>>, %arg4: memref<1x32xf32, #tpu.memory_space<vmem>>, %arg5: memref<1x32xf32, #tpu.memory_space<vmem>>, %arg6: memref<2x32x96xbf16, #tpu.memory_space<vmem>>, %arg7: memref<2x1x96xf32, #tpu.memory_space<vmem>>, %arg8: memref<2x32x32xbf16, #tpu.memory_space<vmem>>, %arg9: memref<2x1x32xf32, #tpu.memory_space<vmem>>, %arg10: memref<2x1x32xf32, #tpu.memory_space<vmem>>, %arg11: memref<2x1x32xf32, #tpu.memory_space<vmem>>, %arg12: memref<2x1x32xf32, #tpu.memory_space<vmem>>, %arg13: memref<2x1x32xf32, #tpu.memory_space<vmem>>, %arg14: memref<2x32x64xbf16, #tpu.memory_space<vmem>>, %arg15: memref<2x1x64xf32, #tpu.memory_space<vmem>>, %arg16: memref<2x64x32xbf16, #tpu.memory_space<vmem>>, %arg17: memref<2x1x32xf32, #tpu.memory_space<vmem>>, %arg18: memref<1x32xf32, #tpu.memory_space<vmem>>, %arg19: memref<1x32xf32, #tpu.memory_space<vmem>>, %arg20: memref<32x16xbf16, #tpu.memory_space<vmem>>, %arg21: memref<1x1x16xf32, #tpu.memory_space<vmem>>) attributes {dimension_semantics = [#tpu.dimension_semantics<parallel>], iteration_bounds = array<i64: 2>, scalar_prefetch = 0 : i64, scratch_operands = 0 : i64, tpu.core_type = #tpu.core_type<tc>, window_params = [{transform_indices = @transform_0, window_bounds = array<i64: 1, 5, 192>}, {pipeline_mode = #tpu.pipeline_mode<synchronous>, transform_indices = @transform_1, window_bounds = array<i64: 192, 32>}, {pipeline_mode = #tpu.pipeline_mode<synchronous>, transform_indices = @transform_2, window_bounds = array<i64: 5, 32>}, {pipeline_mode = #tpu.pipeline_mode<synchronous>, transform_indices = @transform_3, window_bounds = array<i64: 1, 32>}, {pipeline_mode = #tpu.pipeline_mode<synchronous>, transform_indices = @transform_4, window_bounds = array<i64: 1, 32>}, {pipeline_mode = #tpu.pipeline_mode<synchronous>, transform_indices = @transform_5, window_bounds = array<i64: 2, 32, 96>}, {pipeline_mode = #tpu.pipeline_mode<synchronous>, transform_indices = @transform_6, window_bounds = array<i64: 2, 1, 96>}, {pipeline_mode = #tpu.pipeline_mode<synchronous>, transform_indices = @transform_7, window_bounds = array<i64: 2, 32, 32>}, {pipeline_mode = #tpu.pipeline_mode<synchronous>, transform_indices = @transform_8, window_bounds = array<i64: 2, 1, 32>}, {pipeline_mode = #tpu.pipeline_mode<synchronous>, transform_indices = @transform_9, window_bounds = array<i64: 2, 1, 32>}, {pipeline_mode = #tpu.pipeline_mode<synchronous>, transform_indices = @transform_10, window_bounds = array<i64: 2, 1, 32>}, {pipeline_mode = #tpu.pipeline_mode<synchronous>, transform_indices = @transform_11, window_bounds = array<i64: 2, 1, 32>}, {pipeline_mode = #tpu.pipeline_mode<synchronous>, transform_indices = @transform_12, window_bounds = array<i64: 2, 1, 32>}, {pipeline_mode = #tpu.pipeline_mode<synchronous>, transform_indices = @transform_13, window_bounds = array<i64: 2, 32, 64>}, {pipeline_mode = #tpu.pipeline_mode<synchronous>, transform_indices = @transform_14, window_bounds = array<i64: 2, 1, 64>}, {pipeline_mode = #tpu.pipeline_mode<synchronous>, transform_indices = @transform_15, window_bounds = array<i64: 2, 64, 32>}, {pipeline_mode = #tpu.pipeline_mode<synchronous>, transform_indices = @transform_16, window_bounds = array<i64: 2, 1, 32>}, {pipeline_mode = #tpu.pipeline_mode<synchronous>, transform_indices = @transform_17, window_bounds = array<i64: 1, 32>}, {pipeline_mode = #tpu.pipeline_mode<synchronous>, transform_indices = @transform_18, window_bounds = array<i64: 1, 32>}, {pipeline_mode = #tpu.pipeline_mode<synchronous>, transform_indices = @transform_19, window_bounds = array<i64: 32, 16>}, {transform_indices = @transform_20, window_bounds = array<i64: 1, 1, 16>}]} {
    %c0 = arith.constant 0 : index
    %c0_0 = arith.constant 0 : index
    %c0_1 = arith.constant 0 : index
    %0 = vector.load %arg1[%c0, %c0_0, %c0_1] : memref<1x5x192xbf16, #tpu.memory_space<vmem>>, vector<1x5x192xbf16>
    %1 = vector.shape_cast %0 : vector<1x5x192xbf16> to vector<5x192xbf16>
    %c0_2 = arith.constant 0 : index
    %c0_3 = arith.constant 0 : index
    %2 = vector.load %arg2[%c0_2, %c0_3] : memref<192x32xbf16, #tpu.memory_space<vmem>>, vector<192x32xbf16>
    %cst = arith.constant dense<0.000000e+00> : vector<5x32xf32>
    %3 = tpu.matmul %1, %2, %cst {dimension_numbers = #tpu.dot_dimension_numbers<[1], [0], [0], [1], [0, 0, 1, 1], [], []>} : vector<5x192xbf16>, vector<192x32xbf16>, vector<5x32xf32> -> vector<5x32xf32>
    %c0_4 = arith.constant 0 : index
    %c0_5 = arith.constant 0 : index
    %4 = vector.load %arg3[%c0_4, %c0_5] : memref<5x32xf32, #tpu.memory_space<vmem>>, vector<5x32xf32>
    %5 = arith.addf %3, %4 : vector<5x32xf32>
    %c0_6 = arith.constant 0 : index
    %c0_7 = arith.constant 0 : index
    %6 = vector.load %arg4[%c0_6, %c0_7] : memref<1x32xf32, #tpu.memory_space<vmem>>, vector<1x32xf32>
    %c0_8 = arith.constant 0 : index
    %c0_9 = arith.constant 0 : index
    %7 = vector.load %arg5[%c0_8, %c0_9] : memref<1x32xf32, #tpu.memory_space<vmem>>, vector<1x32xf32>
    %cst_10 = arith.constant dense<0.000000e+00> : vector<5xf32>
    %8 = vector.multi_reduction <add>, %5, %cst_10 [1] : vector<5x32xf32> to vector<5xf32>
    %9 = vector.shape_cast %8 : vector<5xf32> to vector<5x1xf32>
    %cst_11 = arith.constant 3.200000e+01 : f32
    %10 = vector.broadcast %cst_11 : f32 to vector<5x1xf32>
    %11 = arith.divf %9, %10 : vector<5x1xf32>
    %12 = vector.broadcast %11 : vector<5x1xf32> to vector<5x32xf32>
    %13 = arith.subf %5, %12 : vector<5x32xf32>
    %14 = arith.mulf %13, %13 : vector<5x32xf32>
    %cst_12 = arith.constant dense<0.000000e+00> : vector<5xf32>
    %15 = vector.multi_reduction <add>, %14, %cst_12 [1] : vector<5x32xf32> to vector<5xf32>
    %16 = vector.shape_cast %15 : vector<5xf32> to vector<5x1xf32>
    %cst_13 = arith.constant 3.200000e+01 : f32
    %17 = vector.broadcast %cst_13 : f32 to vector<5x1xf32>
    %18 = arith.divf %16, %17 : vector<5x1xf32>
    %19 = vector.broadcast %11 : vector<5x1xf32> to vector<5x32xf32>
    %20 = arith.subf %5, %19 : vector<5x32xf32>
    %cst_14 = arith.constant 9.99999974E-6 : f32
    %21 = vector.broadcast %cst_14 : f32 to vector<5x1xf32>
    %22 = arith.addf %18, %21 : vector<5x1xf32>
    %23 = math.rsqrt %22 : vector<5x1xf32>
    %24 = vector.broadcast %23 : vector<5x1xf32> to vector<5x32xf32>
    %25 = arith.mulf %20, %24 : vector<5x32xf32>
    %26 = vector.broadcast %6 : vector<1x32xf32> to vector<5x32xf32>
    %27 = arith.mulf %25, %26 : vector<5x32xf32>
    %28 = vector.broadcast %7 : vector<1x32xf32> to vector<5x32xf32>
    %29 = arith.addf %27, %28 : vector<5x32xf32>
    %c0_15 = arith.constant 0 : index
    %c0_16 = arith.constant 0 : index
    %c0_17 = arith.constant 0 : index
    %30 = vector.load %arg6[%c0_15, %c0_16, %c0_17] : memref<2x32x96xbf16, #tpu.memory_space<vmem>>, vector<1x32x96xbf16>
    %31 = vector.shape_cast %30 : vector<1x32x96xbf16> to vector<32x96xbf16>
    %c0_18 = arith.constant 0 : index
    %c0_19 = arith.constant 0 : index
    %c0_20 = arith.constant 0 : index
    %32 = vector.load %arg7[%c0_18, %c0_19, %c0_20] : memref<2x1x96xf32, #tpu.memory_space<vmem>>, vector<1x1x96xf32>
    %33 = vector.shape_cast %32 : vector<1x1x96xf32> to vector<1x96xf32>
    %c0_21 = arith.constant 0 : index
    %c0_22 = arith.constant 0 : index
    %c0_23 = arith.constant 0 : index
    %34 = vector.load %arg8[%c0_21, %c0_22, %c0_23] : memref<2x32x32xbf16, #tpu.memory_space<vmem>>, vector<1x32x32xbf16>
    %35 = vector.shape_cast %34 : vector<1x32x32xbf16> to vector<32x32xbf16>
    %c0_24 = arith.constant 0 : index
    %c0_25 = arith.constant 0 : index
    %c0_26 = arith.constant 0 : index
    %36 = vector.load %arg9[%c0_24, %c0_25, %c0_26] : memref<2x1x32xf32, #tpu.memory_space<vmem>>, vector<1x1x32xf32>
    %37 = vector.shape_cast %36 : vector<1x1x32xf32> to vector<1x32xf32>
    %c0_27 = arith.constant 0 : index
    %c0_28 = arith.constant 0 : index
    %c0_29 = arith.constant 0 : index
    %38 = vector.load %arg10[%c0_27, %c0_28, %c0_29] : memref<2x1x32xf32, #tpu.memory_space<vmem>>, vector<1x1x32xf32>
    %39 = vector.shape_cast %38 : vector<1x1x32xf32> to vector<1x32xf32>
    %c0_30 = arith.constant 0 : index
    %c0_31 = arith.constant 0 : index
    %c0_32 = arith.constant 0 : index
    %40 = vector.load %arg11[%c0_30, %c0_31, %c0_32] : memref<2x1x32xf32, #tpu.memory_space<vmem>>, vector<1x1x32xf32>
    %41 = vector.shape_cast %40 : vector<1x1x32xf32> to vector<1x32xf32>
    %c0_33 = arith.constant 0 : index
    %c0_34 = arith.constant 0 : index
    %c0_35 = arith.constant 0 : index
    %42 = vector.load %arg12[%c0_33, %c0_34, %c0_35] : memref<2x1x32xf32, #tpu.memory_space<vmem>>, vector<1x1x32xf32>
    %43 = vector.shape_cast %42 : vector<1x1x32xf32> to vector<1x32xf32>
    %c0_36 = arith.constant 0 : index
    %c0_37 = arith.constant 0 : index
    %c0_38 = arith.constant 0 : index
    %44 = vector.load %arg13[%c0_36, %c0_37, %c0_38] : memref<2x1x32xf32, #tpu.memory_space<vmem>>, vector<1x1x32xf32>
    %45 = vector.shape_cast %44 : vector<1x1x32xf32> to vector<1x32xf32>
    %c0_39 = arith.constant 0 : index
    %c0_40 = arith.constant 0 : index
    %c0_41 = arith.constant 0 : index
    %46 = vector.load %arg14[%c0_39, %c0_40, %c0_41] : memref<2x32x64xbf16, #tpu.memory_space<vmem>>, vector<1x32x64xbf16>
    %47 = vector.shape_cast %46 : vector<1x32x64xbf16> to vector<32x64xbf16>
    %c0_42 = arith.constant 0 : index
    %c0_43 = arith.constant 0 : index
    %c0_44 = arith.constant 0 : index
    %48 = vector.load %arg15[%c0_42, %c0_43, %c0_44] : memref<2x1x64xf32, #tpu.memory_space<vmem>>, vector<1x1x64xf32>
    %49 = vector.shape_cast %48 : vector<1x1x64xf32> to vector<1x64xf32>
    %c0_45 = arith.constant 0 : index
    %c0_46 = arith.constant 0 : index
    %c0_47 = arith.constant 0 : index
    %50 = vector.load %arg16[%c0_45, %c0_46, %c0_47] : memref<2x64x32xbf16, #tpu.memory_space<vmem>>, vector<1x64x32xbf16>
    %51 = vector.shape_cast %50 : vector<1x64x32xbf16> to vector<64x32xbf16>
    %c0_48 = arith.constant 0 : index
    %c0_49 = arith.constant 0 : index
    %c0_50 = arith.constant 0 : index
    %52 = vector.load %arg17[%c0_48, %c0_49, %c0_50] : memref<2x1x32xf32, #tpu.memory_space<vmem>>, vector<1x1x32xf32>
    %53 = vector.shape_cast %52 : vector<1x1x32xf32> to vector<1x32xf32>
    %cst_51 = arith.constant dense<0.000000e+00> : vector<5xf32>
    %54 = vector.multi_reduction <add>, %29, %cst_51 [1] : vector<5x32xf32> to vector<5xf32>
    %55 = vector.shape_cast %54 : vector<5xf32> to vector<5x1xf32>
    %cst_52 = arith.constant 3.200000e+01 : f32
    %56 = vector.broadcast %cst_52 : f32 to vector<5x1xf32>
    %57 = arith.divf %55, %56 : vector<5x1xf32>
    %58 = vector.broadcast %57 : vector<5x1xf32> to vector<5x32xf32>
    %59 = arith.subf %29, %58 : vector<5x32xf32>
    %60 = arith.mulf %59, %59 : vector<5x32xf32>
    %cst_53 = arith.constant dense<0.000000e+00> : vector<5xf32>
    %61 = vector.multi_reduction <add>, %60, %cst_53 [1] : vector<5x32xf32> to vector<5xf32>
    %62 = vector.shape_cast %61 : vector<5xf32> to vector<5x1xf32>
    %cst_54 = arith.constant 3.200000e+01 : f32
    %63 = vector.broadcast %cst_54 : f32 to vector<5x1xf32>
    %64 = arith.divf %62, %63 : vector<5x1xf32>
    %65 = vector.broadcast %57 : vector<5x1xf32> to vector<5x32xf32>
    %66 = arith.subf %29, %65 : vector<5x32xf32>
    %cst_55 = arith.constant 9.99999974E-6 : f32
    %67 = vector.broadcast %cst_55 : f32 to vector<5x1xf32>
    %68 = arith.addf %64, %67 : vector<5x1xf32>
    %69 = math.rsqrt %68 : vector<5x1xf32>
    %70 = vector.broadcast %69 : vector<5x1xf32> to vector<5x32xf32>
    %71 = arith.mulf %66, %70 : vector<5x32xf32>
    %72 = vector.broadcast %39 : vector<1x32xf32> to vector<5x32xf32>
    %73 = arith.mulf %71, %72 : vector<5x32xf32>
    %74 = vector.broadcast %41 : vector<1x32xf32> to vector<5x32xf32>
    %75 = arith.addf %73, %74 : vector<5x32xf32>
    %76 = arith.truncf %75 : vector<5x32xf32> to vector<5x32xbf16>
    %cst_56 = arith.constant dense<0.000000e+00> : vector<5x96xf32>
    %77 = tpu.matmul %76, %31, %cst_56 {dimension_numbers = #tpu.dot_dimension_numbers<[1], [0], [0], [1], [0, 0, 1, 1], [], []>} : vector<5x32xbf16>, vector<32x96xbf16>, vector<5x96xf32> -> vector<5x96xf32>
    %78 = vector.broadcast %33 : vector<1x96xf32> to vector<5x96xf32>
    %79 = arith.addf %77, %78 : vector<5x96xf32>
    %80 = vector.extract_strided_slice %79 {offsets = [0, 0], sizes = [5, 32], strides = [1, 1]} : vector<5x96xf32> to vector<5x32xf32>
    %cst_57 = arith.constant 2.500000e-01 : f32
    %81 = vector.broadcast %cst_57 : f32 to vector<5x32xf32>
    %82 = arith.mulf %80, %81 : vector<5x32xf32>
    %83 = vector.extract_strided_slice %79 {offsets = [0, 32], sizes = [5, 32], strides = [1, 1]} : vector<5x96xf32> to vector<5x32xf32>
    %84 = vector.extract_strided_slice %79 {offsets = [0, 64], sizes = [5, 32], strides = [1, 1]} : vector<5x96xf32> to vector<5x32xf32>
    %85 = vector.extract_strided_slice %82 {offsets = [0, 0], sizes = [5, 16], strides = [1, 1]} : vector<5x32xf32> to vector<5x16xf32>
    %86 = vector.shape_cast %85 : vector<5x16xf32> to vector<1x5x16xf32>
    %87 = vector.extract_strided_slice %82 {offsets = [0, 16], sizes = [5, 16], strides = [1, 1]} : vector<5x32xf32> to vector<5x16xf32>
    %88 = vector.shape_cast %87 : vector<5x16xf32> to vector<1x5x16xf32>
    %89 = tpu.concatenate %86, %88 in 0 : vector<1x5x16xf32>, vector<1x5x16xf32> -> vector<2x5x16xf32>
    %90 = vector.extract_strided_slice %83 {offsets = [0, 0], sizes = [5, 16], strides = [1, 1]} : vector<5x32xf32> to vector<5x16xf32>
    %91 = vector.shape_cast %90 : vector<5x16xf32> to vector<1x5x16xf32>
    %92 = vector.extract_strided_slice %83 {offsets = [0, 16], sizes = [5, 16], strides = [1, 1]} : vector<5x32xf32> to vector<5x16xf32>
    %93 = vector.shape_cast %92 : vector<5x16xf32> to vector<1x5x16xf32>
    %94 = tpu.concatenate %91, %93 in 0 : vector<1x5x16xf32>, vector<1x5x16xf32> -> vector<2x5x16xf32>
    %95 = vector.extract_strided_slice %84 {offsets = [0, 0], sizes = [5, 16], strides = [1, 1]} : vector<5x32xf32> to vector<5x16xf32>
    %96 = vector.shape_cast %95 : vector<5x16xf32> to vector<1x5x16xf32>
    %97 = vector.extract_strided_slice %84 {offsets = [0, 16], sizes = [5, 16], strides = [1, 1]} : vector<5x32xf32> to vector<5x16xf32>
    %98 = vector.shape_cast %97 : vector<5x16xf32> to vector<1x5x16xf32>
    %99 = tpu.concatenate %96, %98 in 0 : vector<1x5x16xf32>, vector<1x5x16xf32> -> vector<2x5x16xf32>
    "tpu.trace_start"() <{level = 10 : i32, message = "hqd,hkd->hqk"}> : () -> ()
    %cst_58 = arith.constant dense<0.000000e+00> : vector<2x5x5xf32>
    %100 = tpu.matmul %89, %94, %cst_58 {dimension_numbers = #tpu.dot_dimension_numbers<[2], [2], [1], [1], [0, 0, 0, 1, 1, 1], [0], [0]>} : vector<2x5x16xf32>, vector<2x5x16xf32>, vector<2x5x5xf32> -> vector<2x5x5xf32>
    "tpu.trace_stop"() : () -> ()
    %cst_59 = arith.constant dense<0xFF800000> : vector<2x5xf32>
    %101 = vector.multi_reduction <maximumf>, %100, %cst_59 [2] : vector<2x5x5xf32> to vector<2x5xf32>
    %102 = vector.shape_cast %101 : vector<2x5xf32> to vector<2x5x1xf32>
    %103 = vector.broadcast %102 : vector<2x5x1xf32> to vector<2x5x5xf32>
    %104 = arith.subf %100, %103 : vector<2x5x5xf32>
    %105 = math.exp %104 : vector<2x5x5xf32>
    %cst_60 = arith.constant dense<0.000000e+00> : vector<2x5xf32>
    %106 = vector.multi_reduction <add>, %105, %cst_60 [2] : vector<2x5x5xf32> to vector<2x5xf32>
    %107 = vector.shape_cast %106 : vector<2x5xf32> to vector<2x5x1xf32>
    %108 = tpu.reciprocal %107 {approx = true} : vector<2x5x1xf32> -> vector<2x5x1xf32>
    %109 = vector.broadcast %108 : vector<2x5x1xf32> to vector<2x5x5xf32>
    %110 = arith.mulf %105, %109 : vector<2x5x5xf32>
    "tpu.trace_start"() <{level = 10 : i32, message = "hqk,hkd->hqd"}> : () -> ()
    %cst_61 = arith.constant dense<0.000000e+00> : vector<2x5x16xf32>
    %111 = tpu.matmul %110, %99, %cst_61 {dimension_numbers = #tpu.dot_dimension_numbers<[2], [1], [1], [2], [0, 0, 0, 1, 1, 2], [0], [0]>} : vector<2x5x5xf32>, vector<2x5x16xf32>, vector<2x5x16xf32> -> vector<2x5x16xf32>
    "tpu.trace_stop"() : () -> ()
    %112 = vector.extract_strided_slice %111 {offsets = [0, 0, 0], sizes = [1, 5, 16], strides = [1, 1, 1]} : vector<2x5x16xf32> to vector<1x5x16xf32>
    %113 = vector.shape_cast %112 : vector<1x5x16xf32> to vector<5x16xf32>
    %114 = vector.extract_strided_slice %111 {offsets = [1, 0, 0], sizes = [1, 5, 16], strides = [1, 1, 1]} : vector<2x5x16xf32> to vector<1x5x16xf32>
    %115 = vector.shape_cast %114 : vector<1x5x16xf32> to vector<5x16xf32>
    %116 = tpu.concatenate %113, %115 in 1 : vector<5x16xf32>, vector<5x16xf32> -> vector<5x32xf32>
    %117 = arith.truncf %116 : vector<5x32xf32> to vector<5x32xbf16>
    %cst_62 = arith.constant dense<0.000000e+00> : vector<5x32xf32>
    %118 = tpu.matmul %117, %35, %cst_62 {dimension_numbers = #tpu.dot_dimension_numbers<[1], [0], [0], [1], [0, 0, 1, 1], [], []>} : vector<5x32xbf16>, vector<32x32xbf16>, vector<5x32xf32> -> vector<5x32xf32>
    %119 = arith.addf %29, %118 : vector<5x32xf32>
    %120 = vector.broadcast %37 : vector<1x32xf32> to vector<5x32xf32>
    %121 = arith.addf %119, %120 : vector<5x32xf32>
    %cst_63 = arith.constant dense<0.000000e+00> : vector<5xf32>
    %122 = vector.multi_reduction <add>, %121, %cst_63 [1] : vector<5x32xf32> to vector<5xf32>
    %123 = vector.shape_cast %122 : vector<5xf32> to vector<5x1xf32>
    %cst_64 = arith.constant 3.200000e+01 : f32
    %124 = vector.broadcast %cst_64 : f32 to vector<5x1xf32>
    %125 = arith.divf %123, %124 : vector<5x1xf32>
    %126 = vector.broadcast %125 : vector<5x1xf32> to vector<5x32xf32>
    %127 = arith.subf %121, %126 : vector<5x32xf32>
    %128 = arith.mulf %127, %127 : vector<5x32xf32>
    %cst_65 = arith.constant dense<0.000000e+00> : vector<5xf32>
    %129 = vector.multi_reduction <add>, %128, %cst_65 [1] : vector<5x32xf32> to vector<5xf32>
    %130 = vector.shape_cast %129 : vector<5xf32> to vector<5x1xf32>
    %cst_66 = arith.constant 3.200000e+01 : f32
    %131 = vector.broadcast %cst_66 : f32 to vector<5x1xf32>
    %132 = arith.divf %130, %131 : vector<5x1xf32>
    %133 = vector.broadcast %125 : vector<5x1xf32> to vector<5x32xf32>
    %134 = arith.subf %121, %133 : vector<5x32xf32>
    %cst_67 = arith.constant 9.99999974E-6 : f32
    %135 = vector.broadcast %cst_67 : f32 to vector<5x1xf32>
    %136 = arith.addf %132, %135 : vector<5x1xf32>
    %137 = math.rsqrt %136 : vector<5x1xf32>
    %138 = vector.broadcast %137 : vector<5x1xf32> to vector<5x32xf32>
    %139 = arith.mulf %134, %138 : vector<5x32xf32>
    %140 = vector.broadcast %43 : vector<1x32xf32> to vector<5x32xf32>
    %141 = arith.mulf %139, %140 : vector<5x32xf32>
    %142 = vector.broadcast %45 : vector<1x32xf32> to vector<5x32xf32>
    %143 = arith.addf %141, %142 : vector<5x32xf32>
    %144 = arith.truncf %143 : vector<5x32xf32> to vector<5x32xbf16>
    %cst_68 = arith.constant dense<0.000000e+00> : vector<5x64xf32>
    %145 = tpu.matmul %144, %47, %cst_68 {dimension_numbers = #tpu.dot_dimension_numbers<[1], [0], [0], [1], [0, 0, 1, 1], [], []>} : vector<5x32xbf16>, vector<32x64xbf16>, vector<5x64xf32> -> vector<5x64xf32>
    %146 = vector.broadcast %49 : vector<1x64xf32> to vector<5x64xf32>
    %147 = arith.addf %145, %146 : vector<5x64xf32>
    %cst_69 = arith.constant 1.702000e+00 : f32
    %148 = vector.broadcast %cst_69 : f32 to vector<5x64xf32>
    %149 = arith.mulf %148, %147 : vector<5x64xf32>
    %150 = arith.negf %149 : vector<5x64xf32>
    %151 = math.exp %150 : vector<5x64xf32>
    %cst_70 = arith.constant 1.000000e+00 : f32
    %152 = vector.broadcast %cst_70 : f32 to vector<5x64xf32>
    %153 = arith.addf %152, %151 : vector<5x64xf32>
    %154 = arith.divf %152, %153 : vector<5x64xf32>
    %155 = arith.mulf %147, %154 : vector<5x64xf32>
    %156 = arith.truncf %155 : vector<5x64xf32> to vector<5x64xbf16>
    %cst_71 = arith.constant dense<0.000000e+00> : vector<5x32xf32>
    %157 = tpu.matmul %156, %51, %cst_71 {dimension_numbers = #tpu.dot_dimension_numbers<[1], [0], [0], [1], [0, 0, 1, 1], [], []>} : vector<5x64xbf16>, vector<64x32xbf16>, vector<5x32xf32> -> vector<5x32xf32>
    %158 = arith.addf %121, %157 : vector<5x32xf32>
    %159 = vector.broadcast %53 : vector<1x32xf32> to vector<5x32xf32>
    %160 = arith.addf %158, %159 : vector<5x32xf32>
    %c1 = arith.constant 1 : index
    %c0_72 = arith.constant 0 : index
    %c0_73 = arith.constant 0 : index
    %161 = vector.load %arg6[%c1, %c0_72, %c0_73] : memref<2x32x96xbf16, #tpu.memory_space<vmem>>, vector<1x32x96xbf16>
    %162 = vector.shape_cast %161 : vector<1x32x96xbf16> to vector<32x96xbf16>
    %c1_74 = arith.constant 1 : index
    %c0_75 = arith.constant 0 : index
    %c0_76 = arith.constant 0 : index
    %163 = vector.load %arg7[%c1_74, %c0_75, %c0_76] : memref<2x1x96xf32, #tpu.memory_space<vmem>>, vector<1x1x96xf32>
    %164 = vector.shape_cast %163 : vector<1x1x96xf32> to vector<1x96xf32>
    %c1_77 = arith.constant 1 : index
    %c0_78 = arith.constant 0 : index
    %c0_79 = arith.constant 0 : index
    %165 = vector.load %arg8[%c1_77, %c0_78, %c0_79] : memref<2x32x32xbf16, #tpu.memory_space<vmem>>, vector<1x32x32xbf16>
    %166 = vector.shape_cast %165 : vector<1x32x32xbf16> to vector<32x32xbf16>
    %c1_80 = arith.constant 1 : index
    %c0_81 = arith.constant 0 : index
    %c0_82 = arith.constant 0 : index
    %167 = vector.load %arg9[%c1_80, %c0_81, %c0_82] : memref<2x1x32xf32, #tpu.memory_space<vmem>>, vector<1x1x32xf32>
    %168 = vector.shape_cast %167 : vector<1x1x32xf32> to vector<1x32xf32>
    %c1_83 = arith.constant 1 : index
    %c0_84 = arith.constant 0 : index
    %c0_85 = arith.constant 0 : index
    %169 = vector.load %arg10[%c1_83, %c0_84, %c0_85] : memref<2x1x32xf32, #tpu.memory_space<vmem>>, vector<1x1x32xf32>
    %170 = vector.shape_cast %169 : vector<1x1x32xf32> to vector<1x32xf32>
    %c1_86 = arith.constant 1 : index
    %c0_87 = arith.constant 0 : index
    %c0_88 = arith.constant 0 : index
    %171 = vector.load %arg11[%c1_86, %c0_87, %c0_88] : memref<2x1x32xf32, #tpu.memory_space<vmem>>, vector<1x1x32xf32>
    %172 = vector.shape_cast %171 : vector<1x1x32xf32> to vector<1x32xf32>
    %c1_89 = arith.constant 1 : index
    %c0_90 = arith.constant 0 : index
    %c0_91 = arith.constant 0 : index
    %173 = vector.load %arg12[%c1_89, %c0_90, %c0_91] : memref<2x1x32xf32, #tpu.memory_space<vmem>>, vector<1x1x32xf32>
    %174 = vector.shape_cast %173 : vector<1x1x32xf32> to vector<1x32xf32>
    %c1_92 = arith.constant 1 : index
    %c0_93 = arith.constant 0 : index
    %c0_94 = arith.constant 0 : index
    %175 = vector.load %arg13[%c1_92, %c0_93, %c0_94] : memref<2x1x32xf32, #tpu.memory_space<vmem>>, vector<1x1x32xf32>
    %176 = vector.shape_cast %175 : vector<1x1x32xf32> to vector<1x32xf32>
    %c1_95 = arith.constant 1 : index
    %c0_96 = arith.constant 0 : index
    %c0_97 = arith.constant 0 : index
    %177 = vector.load %arg14[%c1_95, %c0_96, %c0_97] : memref<2x32x64xbf16, #tpu.memory_space<vmem>>, vector<1x32x64xbf16>
    %178 = vector.shape_cast %177 : vector<1x32x64xbf16> to vector<32x64xbf16>
    %c1_98 = arith.constant 1 : index
    %c0_99 = arith.constant 0 : index
    %c0_100 = arith.constant 0 : index
    %179 = vector.load %arg15[%c1_98, %c0_99, %c0_100] : memref<2x1x64xf32, #tpu.memory_space<vmem>>, vector<1x1x64xf32>
    %180 = vector.shape_cast %179 : vector<1x1x64xf32> to vector<1x64xf32>
    %c1_101 = arith.constant 1 : index
    %c0_102 = arith.constant 0 : index
    %c0_103 = arith.constant 0 : index
    %181 = vector.load %arg16[%c1_101, %c0_102, %c0_103] : memref<2x64x32xbf16, #tpu.memory_space<vmem>>, vector<1x64x32xbf16>
    %182 = vector.shape_cast %181 : vector<1x64x32xbf16> to vector<64x32xbf16>
    %c1_104 = arith.constant 1 : index
    %c0_105 = arith.constant 0 : index
    %c0_106 = arith.constant 0 : index
    %183 = vector.load %arg17[%c1_104, %c0_105, %c0_106] : memref<2x1x32xf32, #tpu.memory_space<vmem>>, vector<1x1x32xf32>
    %184 = vector.shape_cast %183 : vector<1x1x32xf32> to vector<1x32xf32>
    %cst_107 = arith.constant dense<0.000000e+00> : vector<5xf32>
    %185 = vector.multi_reduction <add>, %160, %cst_107 [1] : vector<5x32xf32> to vector<5xf32>
    %186 = vector.shape_cast %185 : vector<5xf32> to vector<5x1xf32>
    %cst_108 = arith.constant 3.200000e+01 : f32
    %187 = vector.broadcast %cst_108 : f32 to vector<5x1xf32>
    %188 = arith.divf %186, %187 : vector<5x1xf32>
    %189 = vector.broadcast %188 : vector<5x1xf32> to vector<5x32xf32>
    %190 = arith.subf %160, %189 : vector<5x32xf32>
    %191 = arith.mulf %190, %190 : vector<5x32xf32>
    %cst_109 = arith.constant dense<0.000000e+00> : vector<5xf32>
    %192 = vector.multi_reduction <add>, %191, %cst_109 [1] : vector<5x32xf32> to vector<5xf32>
    %193 = vector.shape_cast %192 : vector<5xf32> to vector<5x1xf32>
    %cst_110 = arith.constant 3.200000e+01 : f32
    %194 = vector.broadcast %cst_110 : f32 to vector<5x1xf32>
    %195 = arith.divf %193, %194 : vector<5x1xf32>
    %196 = vector.broadcast %188 : vector<5x1xf32> to vector<5x32xf32>
    %197 = arith.subf %160, %196 : vector<5x32xf32>
    %cst_111 = arith.constant 9.99999974E-6 : f32
    %198 = vector.broadcast %cst_111 : f32 to vector<5x1xf32>
    %199 = arith.addf %195, %198 : vector<5x1xf32>
    %200 = math.rsqrt %199 : vector<5x1xf32>
    %201 = vector.broadcast %200 : vector<5x1xf32> to vector<5x32xf32>
    %202 = arith.mulf %197, %201 : vector<5x32xf32>
    %203 = vector.broadcast %170 : vector<1x32xf32> to vector<5x32xf32>
    %204 = arith.mulf %202, %203 : vector<5x32xf32>
    %205 = vector.broadcast %172 : vector<1x32xf32> to vector<5x32xf32>
    %206 = arith.addf %204, %205 : vector<5x32xf32>
    %207 = arith.truncf %206 : vector<5x32xf32> to vector<5x32xbf16>
    %cst_112 = arith.constant dense<0.000000e+00> : vector<5x96xf32>
    %208 = tpu.matmul %207, %162, %cst_112 {dimension_numbers = #tpu.dot_dimension_numbers<[1], [0], [0], [1], [0, 0, 1, 1], [], []>} : vector<5x32xbf16>, vector<32x96xbf16>, vector<5x96xf32> -> vector<5x96xf32>
    %209 = vector.broadcast %164 : vector<1x96xf32> to vector<5x96xf32>
    %210 = arith.addf %208, %209 : vector<5x96xf32>
    %211 = vector.extract_strided_slice %210 {offsets = [0, 0], sizes = [5, 32], strides = [1, 1]} : vector<5x96xf32> to vector<5x32xf32>
    %cst_113 = arith.constant 2.500000e-01 : f32
    %212 = vector.broadcast %cst_113 : f32 to vector<5x32xf32>
    %213 = arith.mulf %211, %212 : vector<5x32xf32>
    %214 = vector.extract_strided_slice %210 {offsets = [0, 32], sizes = [5, 32], strides = [1, 1]} : vector<5x96xf32> to vector<5x32xf32>
    %215 = vector.extract_strided_slice %210 {offsets = [0, 64], sizes = [5, 32], strides = [1, 1]} : vector<5x96xf32> to vector<5x32xf32>
    %216 = vector.extract_strided_slice %213 {offsets = [0, 0], sizes = [5, 16], strides = [1, 1]} : vector<5x32xf32> to vector<5x16xf32>
    %217 = vector.shape_cast %216 : vector<5x16xf32> to vector<1x5x16xf32>
    %218 = vector.extract_strided_slice %213 {offsets = [0, 16], sizes = [5, 16], strides = [1, 1]} : vector<5x32xf32> to vector<5x16xf32>
    %219 = vector.shape_cast %218 : vector<5x16xf32> to vector<1x5x16xf32>
    %220 = tpu.concatenate %217, %219 in 0 : vector<1x5x16xf32>, vector<1x5x16xf32> -> vector<2x5x16xf32>
    %221 = vector.extract_strided_slice %214 {offsets = [0, 0], sizes = [5, 16], strides = [1, 1]} : vector<5x32xf32> to vector<5x16xf32>
    %222 = vector.shape_cast %221 : vector<5x16xf32> to vector<1x5x16xf32>
    %223 = vector.extract_strided_slice %214 {offsets = [0, 16], sizes = [5, 16], strides = [1, 1]} : vector<5x32xf32> to vector<5x16xf32>
    %224 = vector.shape_cast %223 : vector<5x16xf32> to vector<1x5x16xf32>
    %225 = tpu.concatenate %222, %224 in 0 : vector<1x5x16xf32>, vector<1x5x16xf32> -> vector<2x5x16xf32>
    %226 = vector.extract_strided_slice %215 {offsets = [0, 0], sizes = [5, 16], strides = [1, 1]} : vector<5x32xf32> to vector<5x16xf32>
    %227 = vector.shape_cast %226 : vector<5x16xf32> to vector<1x5x16xf32>
    %228 = vector.extract_strided_slice %215 {offsets = [0, 16], sizes = [5, 16], strides = [1, 1]} : vector<5x32xf32> to vector<5x16xf32>
    %229 = vector.shape_cast %228 : vector<5x16xf32> to vector<1x5x16xf32>
    %230 = tpu.concatenate %227, %229 in 0 : vector<1x5x16xf32>, vector<1x5x16xf32> -> vector<2x5x16xf32>
    "tpu.trace_start"() <{level = 10 : i32, message = "hqd,hkd->hqk"}> : () -> ()
    %cst_114 = arith.constant dense<0.000000e+00> : vector<2x5x5xf32>
    %231 = tpu.matmul %220, %225, %cst_114 {dimension_numbers = #tpu.dot_dimension_numbers<[2], [2], [1], [1], [0, 0, 0, 1, 1, 1], [0], [0]>} : vector<2x5x16xf32>, vector<2x5x16xf32>, vector<2x5x5xf32> -> vector<2x5x5xf32>
    "tpu.trace_stop"() : () -> ()
    %cst_115 = arith.constant dense<0xFF800000> : vector<2x5xf32>
    %232 = vector.multi_reduction <maximumf>, %231, %cst_115 [2] : vector<2x5x5xf32> to vector<2x5xf32>
    %233 = vector.shape_cast %232 : vector<2x5xf32> to vector<2x5x1xf32>
    %234 = vector.broadcast %233 : vector<2x5x1xf32> to vector<2x5x5xf32>
    %235 = arith.subf %231, %234 : vector<2x5x5xf32>
    %236 = math.exp %235 : vector<2x5x5xf32>
    %cst_116 = arith.constant dense<0.000000e+00> : vector<2x5xf32>
    %237 = vector.multi_reduction <add>, %236, %cst_116 [2] : vector<2x5x5xf32> to vector<2x5xf32>
    %238 = vector.shape_cast %237 : vector<2x5xf32> to vector<2x5x1xf32>
    %239 = tpu.reciprocal %238 {approx = true} : vector<2x5x1xf32> -> vector<2x5x1xf32>
    %240 = vector.broadcast %239 : vector<2x5x1xf32> to vector<2x5x5xf32>
    %241 = arith.mulf %236, %240 : vector<2x5x5xf32>
    "tpu.trace_start"() <{level = 10 : i32, message = "hqk,hkd->hqd"}> : () -> ()
    %cst_117 = arith.constant dense<0.000000e+00> : vector<2x5x16xf32>
    %242 = tpu.matmul %241, %230, %cst_117 {dimension_numbers = #tpu.dot_dimension_numbers<[2], [1], [1], [2], [0, 0, 0, 1, 1, 2], [0], [0]>} : vector<2x5x5xf32>, vector<2x5x16xf32>, vector<2x5x16xf32> -> vector<2x5x16xf32>
    "tpu.trace_stop"() : () -> ()
    %243 = vector.extract_strided_slice %242 {offsets = [0, 0, 0], sizes = [1, 5, 16], strides = [1, 1, 1]} : vector<2x5x16xf32> to vector<1x5x16xf32>
    %244 = vector.shape_cast %243 : vector<1x5x16xf32> to vector<5x16xf32>
    %245 = vector.extract_strided_slice %242 {offsets = [1, 0, 0], sizes = [1, 5, 16], strides = [1, 1, 1]} : vector<2x5x16xf32> to vector<1x5x16xf32>
    %246 = vector.shape_cast %245 : vector<1x5x16xf32> to vector<5x16xf32>
    %247 = tpu.concatenate %244, %246 in 1 : vector<5x16xf32>, vector<5x16xf32> -> vector<5x32xf32>
    %248 = arith.truncf %247 : vector<5x32xf32> to vector<5x32xbf16>
    %cst_118 = arith.constant dense<0.000000e+00> : vector<5x32xf32>
    %249 = tpu.matmul %248, %166, %cst_118 {dimension_numbers = #tpu.dot_dimension_numbers<[1], [0], [0], [1], [0, 0, 1, 1], [], []>} : vector<5x32xbf16>, vector<32x32xbf16>, vector<5x32xf32> -> vector<5x32xf32>
    %250 = arith.addf %160, %249 : vector<5x32xf32>
    %251 = vector.broadcast %168 : vector<1x32xf32> to vector<5x32xf32>
    %252 = arith.addf %250, %251 : vector<5x32xf32>
    %cst_119 = arith.constant dense<0.000000e+00> : vector<5xf32>
    %253 = vector.multi_reduction <add>, %252, %cst_119 [1] : vector<5x32xf32> to vector<5xf32>
    %254 = vector.shape_cast %253 : vector<5xf32> to vector<5x1xf32>
    %cst_120 = arith.constant 3.200000e+01 : f32
    %255 = vector.broadcast %cst_120 : f32 to vector<5x1xf32>
    %256 = arith.divf %254, %255 : vector<5x1xf32>
    %257 = vector.broadcast %256 : vector<5x1xf32> to vector<5x32xf32>
    %258 = arith.subf %252, %257 : vector<5x32xf32>
    %259 = arith.mulf %258, %258 : vector<5x32xf32>
    %cst_121 = arith.constant dense<0.000000e+00> : vector<5xf32>
    %260 = vector.multi_reduction <add>, %259, %cst_121 [1] : vector<5x32xf32> to vector<5xf32>
    %261 = vector.shape_cast %260 : vector<5xf32> to vector<5x1xf32>
    %cst_122 = arith.constant 3.200000e+01 : f32
    %262 = vector.broadcast %cst_122 : f32 to vector<5x1xf32>
    %263 = arith.divf %261, %262 : vector<5x1xf32>
    %264 = vector.broadcast %256 : vector<5x1xf32> to vector<5x32xf32>
    %265 = arith.subf %252, %264 : vector<5x32xf32>
    %cst_123 = arith.constant 9.99999974E-6 : f32
    %266 = vector.broadcast %cst_123 : f32 to vector<5x1xf32>
    %267 = arith.addf %263, %266 : vector<5x1xf32>
    %268 = math.rsqrt %267 : vector<5x1xf32>
    %269 = vector.broadcast %268 : vector<5x1xf32> to vector<5x32xf32>
    %270 = arith.mulf %265, %269 : vector<5x32xf32>
    %271 = vector.broadcast %174 : vector<1x32xf32> to vector<5x32xf32>
    %272 = arith.mulf %270, %271 : vector<5x32xf32>
    %273 = vector.broadcast %176 : vector<1x32xf32> to vector<5x32xf32>
    %274 = arith.addf %272, %273 : vector<5x32xf32>
    %275 = arith.truncf %274 : vector<5x32xf32> to vector<5x32xbf16>
    %cst_124 = arith.constant dense<0.000000e+00> : vector<5x64xf32>
    %276 = tpu.matmul %275, %178, %cst_124 {dimension_numbers = #tpu.dot_dimension_numbers<[1], [0], [0], [1], [0, 0, 1, 1], [], []>} : vector<5x32xbf16>, vector<32x64xbf16>, vector<5x64xf32> -> vector<5x64xf32>
    %277 = vector.broadcast %180 : vector<1x64xf32> to vector<5x64xf32>
    %278 = arith.addf %276, %277 : vector<5x64xf32>
    %cst_125 = arith.constant 1.702000e+00 : f32
    %279 = vector.broadcast %cst_125 : f32 to vector<5x64xf32>
    %280 = arith.mulf %279, %278 : vector<5x64xf32>
    %281 = arith.negf %280 : vector<5x64xf32>
    %282 = math.exp %281 : vector<5x64xf32>
    %cst_126 = arith.constant 1.000000e+00 : f32
    %283 = vector.broadcast %cst_126 : f32 to vector<5x64xf32>
    %284 = arith.addf %283, %282 : vector<5x64xf32>
    %285 = arith.divf %283, %284 : vector<5x64xf32>
    %286 = arith.mulf %278, %285 : vector<5x64xf32>
    %287 = arith.truncf %286 : vector<5x64xf32> to vector<5x64xbf16>
    %cst_127 = arith.constant dense<0.000000e+00> : vector<5x32xf32>
    %288 = tpu.matmul %287, %182, %cst_127 {dimension_numbers = #tpu.dot_dimension_numbers<[1], [0], [0], [1], [0, 0, 1, 1], [], []>} : vector<5x64xbf16>, vector<64x32xbf16>, vector<5x32xf32> -> vector<5x32xf32>
    %289 = arith.addf %252, %288 : vector<5x32xf32>
    %290 = vector.broadcast %184 : vector<1x32xf32> to vector<5x32xf32>
    %291 = arith.addf %289, %290 : vector<5x32xf32>
    %292 = vector.extract_strided_slice %291 {offsets = [0, 0], sizes = [1, 32], strides = [1, 1]} : vector<5x32xf32> to vector<1x32xf32>
    %c0_128 = arith.constant 0 : index
    %c0_129 = arith.constant 0 : index
    %293 = vector.load %arg18[%c0_128, %c0_129] : memref<1x32xf32, #tpu.memory_space<vmem>>, vector<1x32xf32>
    %c0_130 = arith.constant 0 : index
    %c0_131 = arith.constant 0 : index
    %294 = vector.load %arg19[%c0_130, %c0_131] : memref<1x32xf32, #tpu.memory_space<vmem>>, vector<1x32xf32>
    %cst_132 = arith.constant dense<0.000000e+00> : vector<1xf32>
    %295 = vector.multi_reduction <add>, %292, %cst_132 [1] : vector<1x32xf32> to vector<1xf32>
    %296 = vector.shape_cast %295 : vector<1xf32> to vector<1x1xf32>
    %cst_133 = arith.constant 3.200000e+01 : f32
    %297 = vector.broadcast %cst_133 : f32 to vector<1x1xf32>
    %298 = arith.divf %296, %297 : vector<1x1xf32>
    %299 = vector.broadcast %298 : vector<1x1xf32> to vector<1x32xf32>
    %300 = arith.subf %292, %299 : vector<1x32xf32>
    %301 = arith.mulf %300, %300 : vector<1x32xf32>
    %cst_134 = arith.constant dense<0.000000e+00> : vector<1xf32>
    %302 = vector.multi_reduction <add>, %301, %cst_134 [1] : vector<1x32xf32> to vector<1xf32>
    %303 = vector.shape_cast %302 : vector<1xf32> to vector<1x1xf32>
    %cst_135 = arith.constant 3.200000e+01 : f32
    %304 = vector.broadcast %cst_135 : f32 to vector<1x1xf32>
    %305 = arith.divf %303, %304 : vector<1x1xf32>
    %306 = vector.broadcast %298 : vector<1x1xf32> to vector<1x32xf32>
    %307 = arith.subf %292, %306 : vector<1x32xf32>
    %cst_136 = arith.constant 9.99999974E-6 : f32
    %308 = vector.broadcast %cst_136 : f32 to vector<1x1xf32>
    %309 = arith.addf %305, %308 : vector<1x1xf32>
    %310 = math.rsqrt %309 : vector<1x1xf32>
    %311 = vector.broadcast %310 : vector<1x1xf32> to vector<1x32xf32>
    %312 = arith.mulf %307, %311 : vector<1x32xf32>
    %313 = arith.mulf %312, %293 : vector<1x32xf32>
    %314 = arith.addf %313, %294 : vector<1x32xf32>
    %315 = arith.truncf %314 : vector<1x32xf32> to vector<1x32xbf16>
    %c0_137 = arith.constant 0 : index
    %c0_138 = arith.constant 0 : index
    %316 = vector.load %arg20[%c0_137, %c0_138] : memref<32x16xbf16, #tpu.memory_space<vmem>>, vector<32x16xbf16>
    %cst_139 = arith.constant dense<0.000000e+00> : vector<1x16xf32>
    %317 = tpu.matmul %315, %316, %cst_139 {dimension_numbers = #tpu.dot_dimension_numbers<[1], [0], [0], [1], [0, 0, 1, 1], [], []>} : vector<1x32xbf16>, vector<32x16xbf16>, vector<1x16xf32> -> vector<1x16xf32>
    %c0_140 = arith.constant 0 : index
    %c0_141 = arith.constant 0 : index
    %c0_142 = arith.constant 0 : index
    %318 = vector.load %arg21[%c0_140, %c0_141, %c0_142] : memref<1x1x16xf32, #tpu.memory_space<vmem>>, vector<1x1x16xf32>
    %319 = vector.shape_cast %318 : vector<1x1x16xf32> to vector<1x16xf32>
    %320 = vector.shape_cast %317 : vector<1x16xf32> to vector<1x1x16xf32>
    tpu.vector_store %arg21[%c0_140, %c0_141, %c0_142], %320 {strides = array<i32>} : memref<1x1x16xf32, #tpu.memory_space<vmem>>, vector<1x1x16xf32>,
    return
  }
  func.func @transform_0(%arg0: i32) -> (i32, i32, i32) {
    %c0_i32 = arith.constant 0 : i32
    %c0_i32_0 = arith.constant 0 : i32
    %c0_i32_1 = arith.constant 0 : i32
    return %arg0, %c0_i32, %c0_i32_0 : i32, i32, i32
  }
  func.func @transform_1(%arg0: i32) -> (i32, i32) {
    %c0_i32 = arith.constant 0 : i32
    %c0_i32_0 = arith.constant 0 : i32
    %c0_i32_1 = arith.constant 0 : i32
    return %c0_i32, %c0_i32_0 : i32, i32
  }
  func.func @transform_2(%arg0: i32) -> (i32, i32) {
    %c0_i32 = arith.constant 0 : i32
    %c0_i32_0 = arith.constant 0 : i32
    %c0_i32_1 = arith.constant 0 : i32
    return %c0_i32, %c0_i32_0 : i32, i32
  }
  func.func @transform_3(%arg0: i32) -> (i32, i32) {
    %c0_i32 = arith.constant 0 : i32
    %c0_i32_0 = arith.constant 0 : i32
    %c0_i32_1 = arith.constant 0 : i32
    return %c0_i32, %c0_i32_0 : i32, i32
  }
  func.func @transform_4(%arg0: i32) -> (i32, i32) {
    %c0_i32 = arith.constant 0 : i32
    %c0_i32_0 = arith.constant 0 : i32
    %c0_i32_1 = arith.constant 0 : i32
    return %c0_i32, %c0_i32_0 : i32, i32
  }
  func.func @transform_5(%arg0: i32) -> (i32, i32, i32) {
    %c0_i32 = arith.constant 0 : i32
    %c0_i32_0 = arith.constant 0 : i32
    %c0_i32_1 = arith.constant 0 : i32
    %c0_i32_2 = arith.constant 0 : i32
    return %c0_i32, %c0_i32_0, %c0_i32_1 : i32, i32, i32
  }
  func.func @transform_6(%arg0: i32) -> (i32, i32, i32) {
    %c0_i32 = arith.constant 0 : i32
    %c0_i32_0 = arith.constant 0 : i32
    %c0_i32_1 = arith.constant 0 : i32
    %c0_i32_2 = arith.constant 0 : i32
    return %c0_i32, %c0_i32_0, %c0_i32_1 : i32, i32, i32
  }
  func.func @transform_7(%arg0: i32) -> (i32, i32, i32) {
    %c0_i32 = arith.constant 0 : i32
    %c0_i32_0 = arith.constant 0 : i32
    %c0_i32_1 = arith.constant 0 : i32
    %c0_i32_2 = arith.constant 0 : i32
    return %c0_i32, %c0_i32_0, %c0_i32_1 : i32, i32, i32
  }
  func.func @transform_8(%arg0: i32) -> (i32, i32, i32) {
    %c0_i32 = arith.constant 0 : i32
    %c0_i32_0 = arith.constant 0 : i32
    %c0_i32_1 = arith.constant 0 : i32
    %c0_i32_2 = arith.constant 0 : i32
    return %c0_i32, %c0_i32_0, %c0_i32_1 : i32, i32, i32
  }
  func.func @transform_9(%arg0: i32) -> (i32, i32, i32) {
    %c0_i32 = arith.constant 0 : i32
    %c0_i32_0 = arith.constant 0 : i32
    %c0_i32_1 = arith.constant 0 : i32
    %c0_i32_2 = arith.constant 0 : i32
    return %c0_i32, %c0_i32_0, %c0_i32_1 : i32, i32, i32
  }
  func.func @transform_10(%arg0: i32) -> (i32, i32, i32) {
    %c0_i32 = arith.constant 0 : i32
    %c0_i32_0 = arith.constant 0 : i32
    %c0_i32_1 = arith.constant 0 : i32
    %c0_i32_2 = arith.constant 0 : i32
    return %c0_i32, %c0_i32_0, %c0_i32_1 : i32, i32, i32
  }
  func.func @transform_11(%arg0: i32) -> (i32, i32, i32) {
    %c0_i32 = arith.constant 0 : i32
    %c0_i32_0 = arith.constant 0 : i32
    %c0_i32_1 = arith.constant 0 : i32
    %c0_i32_2 = arith.constant 0 : i32
    return %c0_i32, %c0_i32_0, %c0_i32_1 : i32, i32, i32
  }
  func.func @transform_12(%arg0: i32) -> (i32, i32, i32) {
    %c0_i32 = arith.constant 0 : i32
    %c0_i32_0 = arith.constant 0 : i32
    %c0_i32_1 = arith.constant 0 : i32
    %c0_i32_2 = arith.constant 0 : i32
    return %c0_i32, %c0_i32_0, %c0_i32_1 : i32, i32, i32
  }
  func.func @transform_13(%arg0: i32) -> (i32, i32, i32) {
    %c0_i32 = arith.constant 0 : i32
    %c0_i32_0 = arith.constant 0 : i32
    %c0_i32_1 = arith.constant 0 : i32
    %c0_i32_2 = arith.constant 0 : i32
    return %c0_i32, %c0_i32_0, %c0_i32_1 : i32, i32, i32
  }
  func.func @transform_14(%arg0: i32) -> (i32, i32, i32) {
    %c0_i32 = arith.constant 0 : i32
    %c0_i32_0 = arith.constant 0 : i32
    %c0_i32_1 = arith.constant 0 : i32
    %c0_i32_2 = arith.constant 0 : i32
    return %c0_i32, %c0_i32_0, %c0_i32_1 : i32, i32, i32
  }
  func.func @transform_15(%arg0: i32) -> (i32, i32, i32) {
    %c0_i32 = arith.constant 0 : i32
    %c0_i32_0 = arith.constant 0 : i32
    %c0_i32_1 = arith.constant 0 : i32
    %c0_i32_2 = arith.constant 0 : i32
    return %c0_i32, %c0_i32_0, %c0_i32_1 : i32, i32, i32
  }
  func.func @transform_16(%arg0: i32) -> (i32, i32, i32) {
    %c0_i32 = arith.constant 0 : i32
    %c0_i32_0 = arith.constant 0 : i32
    %c0_i32_1 = arith.constant 0 : i32
    %c0_i32_2 = arith.constant 0 : i32
    return %c0_i32, %c0_i32_0, %c0_i32_1 : i32, i32, i32
  }
  func.func @transform_17(%arg0: i32) -> (i32, i32) {
    %c0_i32 = arith.constant 0 : i32
    %c0_i32_0 = arith.constant 0 : i32
    %c0_i32_1 = arith.constant 0 : i32
    return %c0_i32, %c0_i32_0 : i32, i32
  }
  func.func @transform_18(%arg0: i32) -> (i32, i32) {
    %c0_i32 = arith.constant 0 : i32
    %c0_i32_0 = arith.constant 0 : i32
    %c0_i32_1 = arith.constant 0 : i32
    return %c0_i32, %c0_i32_0 : i32, i32
  }
  func.func @transform_19(%arg0: i32) -> (i32, i32) {
    %c0_i32 = arith.constant 0 : i32
    %c0_i32_0 = arith.constant 0 : i32
    %c0_i32_1 = arith.constant 0 : i32
    return %c0_i32, %c0_i32_0 : i32, i32
  }
  func.func @transform_20(%arg0: i32) -> (i32, i32, i32) {
    %c0_i32 = arith.constant 0 : i32
    %c0_i32_0 = arith.constant 0 : i32
    %c0_i32_1 = arith.constant 0 : i32
    return %arg0, %c0_i32, %c0_i32_0 : i32, i32, i32
  }
}

</mosaic_0001>

<bundles_post_ra>
// kernel: vision_forward.1
= control target key start
LH: loop header
LB: loop body
LE: loop exit
PB: predicated region body
PF: predicated region fallthrough
CT: control target
= control target key end

     0   :  { %s2588_s0 = inlined_call_operand.vmem [shape: bf16[2,5,192], index: 0, kind: input, shape index: {}]   ;;  %s2589_s1 = inlined_call_operand.vmem [shape: bf16[192,32], index: 1, kind: input, shape index: {}]   ;;  %s2590_s2 = inlined_call_operand.vmem [shape: f32[5,32], index: 2, kind: input, shape index: {}]   ;;  %s2591_s3 = inlined_call_operand.vmem [shape: f32[1,32], index: 3, kind: input, shape index: {}]   ;;  %s2592_s4 = inlined_call_operand.vmem [shape: f32[1,32], index: 4, kind: input, shape index: {}]   ;;  %s2593_s5 = inlined_call_operand.vmem [shape: bf16[2,32,96], index: 5, kind: input, shape index: {}]   ;;  %s2594_s6 = inlined_call_operand.vmem [shape: f32[2,1,96], index: 6, kind: input, shape index: {}]   ;;  %s2595_s7 = inlined_call_operand.vmem [shape: bf16[2,32,32], index: 7, kind: input, shape index: {}]   ;;  %s2596_s8 = inlined_call_operand.vmem [shape: f32[2,1,32], index: 8, kind: input, shape index: {}]   ;;  %s2597_s9 = inlined_call_operand.vmem [shape: f32[2,1,32], index: 9, kind: input, shape index: {}]   ;;  %s2598_s10 = inlined_call_operand.vmem [shape: f32[2,1,32], index: 10, kind: input, shape index: {}]   ;;  %s2599_s11 = inlined_call_operand.vmem [shape: f32[2,1,32], index: 11, kind: input, shape index: {}]   ;;  %s2600_s12 = inlined_call_operand.vmem [shape: f32[2,1,32], index: 12, kind: input, shape index: {}]   ;;  %s2601_s13 = inlined_call_operand.vmem [shape: bf16[2,32,64], index: 13, kind: input, shape index: {}]   ;;  %s2602_s14 = inlined_call_operand.vmem [shape: f32[2,1,64], index: 14, kind: input, shape index: {}]   ;;  %s2603_s15 = inlined_call_operand.vmem [shape: bf16[2,64,32], index: 15, kind: input, shape index: {}]   ;;  %s2604_s16 = inlined_call_operand.vmem [shape: f32[2,1,32], index: 16, kind: input, shape index: {}]   ;;  %s2605_s17 = inlined_call_operand.vmem [shape: f32[1,32], index: 17, kind: input, shape index: {}]   ;;  %s2606_s18 = inlined_call_operand.vmem [shape: f32[1,32], index: 18, kind: input, shape index: {}]   ;;  %s2607_s19 = inlined_call_operand.vmem [shape: bf16[32,16], index: 19, kind: input, shape index: {}]   ;;  %s2608_s20 = inlined_call_operand.hbm [shape: f32[2,1,16], index: 20, kind: output, shape index: {}]  }
   0x1   :  { %2620 = sst [smem:[#allocation12_spill]] %s2588_s0 }
   0x2   :  { %2621 = sst [smem:[#allocation13_spill]] %s2589_s1 }
   0x3   :  { %2622 = sst [smem:[#allocation14_spill]] %s2590_s2 }
   0x4   :  { %2623 = sst [smem:[#allocation15_spill]] %s2591_s3 }
   0x5   :  { %2624 = sst [smem:[#allocation16_spill]] %s2592_s4 }
   0x6   :  { %2625 = sst [smem:[#allocation17_spill]] %s2593_s5 }
   0x7   :  { %2626 = sst [smem:[#allocation18_spill]] %s2594_s6 }
   0x8   :  { %2627 = sst [smem:[#allocation19_spill]] %s2608_s20 }
   0x9   :  { %25 = vsyncpa [#allocation3], 0 }
   0xa   :  { %27 = vsyncpa [#allocation3 + $0x1], 0  ;;  %s2244_s1 = smov 0   ;;  %s2246_s22 = smov 0  }
   0xb   :  { %s2248_s23 = smov 0   ;;  %s2250_s24 = smov 0  }
   0xc LB: > { %2628 = sst [smem:[#allocation5_spill]] %s2120_s1  ;;  %s2265_s2 = sadd.s32 4294967295, %s2132_s24   ;;  %s2132_s24 = sphi %s2250_s24, %s2651_s24   ;;  %s2128_s23 = sphi %s2248_s23, %s2653_s23   ;;  %s2124_s22 = sphi %s2246_s22, %s2655_s22   ;;  %s2120_s1 = sphi %s2244_s1, %s2654_s1  }
   0xd   : > { %2629 = sst [smem:[#allocation6_spill]] %s2128_s23  ;;  %s1735_s25 = sadd.s32 4294967294, %s2132_s24  }
   0xe   : > { %2630 = sst [smem:[#allocation7_spill]] %s2132_s24  ;;  %s2269_s3 = sadd.s32 1, %s2132_s24  }
   0xf   : > { %2631 = sst [smem:[#allocation8_spill]] %s2269_s3  ;;  %s465_s26 = sadd.s32 1, %s2128_s23 }
  0x10   : > { %s462_s27 = ssub.s32 %s2132_s24, %s2269_s3  ;;  %p475_p0 = scmp.ne.s32.totalorder %s2128_s23, %s2124_s22 }
  0x11   : > { %p463_p1 = scmp.eq.s32.totalorder %s462_s27, 0  ;;  %p476_p2 = scmp.eq.s32.totalorder %s2265_s2, 1 }
  0x12   : > { %p481_p3 = scmp.ne.s32.totalorder %s2124_s22, %s2120_s1  ;;  %p482_p4 = scmp.eq.s32.totalorder %s1735_s25, 1 }
  0x13   : > { %s2280_s28 = scalar_select %p463_p1, %s2128_s23, %s465_s26  }
  0x14   : > { %p2282_p5 = por %p476_p2, %p475_p0  ;;  %p2286_p6 = por %p482_p4, %p481_p3 }
  0x15   : > { %2632 = sst [smem:[#allocation9_spill]] %s2280_s28  ;;  %p1738_p7 = scmp.ge.s32.totalorder %s2132_s24, 1 }
  0x16   : > { %s2633_s4 = scalar_select %p2282_p5, 1, 0 }
  0x17   : > { %s2635_s29 = scalar_select %p2286_p6, 1, 0 }
  0x18   : > { %2634 = sst [smem:[#allocation10_spill]] %s2633_s4  ;;  %p565_p8 = scmp.lt.s32.totalorder %s2132_s24, 3 }
  0x19   : > { %2636 = sst [smem:[#allocation11_spill]] %s2635_s29 }
  0x1a   : > { %p566_p9 = pnand %p1738_p7, %p565_p8 }
  0x1b   : > { %s2637_s21 = sld [smem:[#allocation13_spill]] (!%p566_p9)  ;;  %p622_p10 = scmp.lt.s32.totalorder (!%p566_p9), %s2265_s2, 1 }
  0x1c   : > { %569 = sbr.rel (%p566_p9) target bundleno = 4785 (0x12b1), region = 100  ;;  %s2638_s4 = sld [smem:[#allocation12_spill]] (!%p566_p9) }
  0x1d   : > { %s2639_s3 = sld [smem:[#allocation14_spill]] (!%p566_p9)  ;;  %s2135_s24 = smov (!%p566_p9), 112  }
  0x1e   : > { %s2640_s20 = sld [smem:[#allocation15_spill]] (!%p566_p9)  ;;  %s2619_s25 = smov (!%p566_p9), 16  }
  0x1f   : > { %s2642_s5 = sld [smem:[#allocation17_spill]] (!%p566_p9)  ;;  %s620_s27 = sand.u32 (!%p566_p9), 1, %s2124_s22  }
  0x20   : > { %s2643_s6 = sld [smem:[#allocation18_spill]] (!%p566_p9)  ;;  %s621_s29 = scalar_lea.vmem (!%p566_p9), [#allocation2], %s620_s27 }
  0x21   : > { %v1943_v0 = vld [vmem:[%s2637_s21 + $0x38] sm:$0xff]  ;;  %v1942_v2 = vld [vmem:[%s2637_s21 + $0x30] sm:$0xff]  ;;  %s623_s23 = scalar_select %p622_p10, %s2265_s2, 1  ;;  %v1941_v4 = vld [vmem:[%s2637_s21 + $0x28] sm:$0xff]  ;;  %vm732_vm0 = vcmask 523264   ;;  %vm764_vm1 = vcmask 258048  }
  0x22   : > { %v1947_v1 = vld [vmem:[%s2637_s21 + $0x58] sm:$0xff]  ;;  %736 = vmatpush.bf16.msra.mxu0 %v1943_v0  ;;  %v1946_v3 = vld [vmem:[%s2637_s21 + $0x50] sm:$0xff]  ;;  %v1945_v5 = vld [vmem:[%s2637_s21 + $0x48] sm:$0xff]  ;;  %v2134_v25 = vmov 32.0   ;;  %vm876_vm9 = vcmask 261120   ;;  %vm902_vm10 = vcmask 130048  }
  0x23   : > { %753 = vmatpush.bf16.msra.mxu1 %v1947_v1  ;;  %s1935_s1 = sshll.u32 %s623_s23, 3  ;;  %v1940_v7 = vld [vmem:[%s2637_s21 + $0x20] sm:$0xff]  ;;  %v1939_v10 = vld [vmem:[%s2637_s21 + $0x18] sm:$0xff]  ;;  %v1938_v12 = vld [vmem:[%s2637_s21 + $0x10] sm:$0xff]  ;;  %2032 = vrcp.f32 %v2134_v25  ;;  %vm953_vm11 = vcmask 36864   ;;  %vm982_vm12 = vcmask 1044480  }
  0x24   : > { %s626_s28 = scalar_lea.vmem %s2638_s4, %s1935_s1  ;;  %v1944_v9 = vld [vmem:[%s2637_s21 + $0x40] sm:$0xff]  ;;  %v1937_v13 = vld [vmem:[%s2637_s21 + $0x8] sm:$0xff]  ;;  %s2641_s4 = sld [smem:[#allocation16_spill]]  ;;  %vm978_vm13 = vcmask 39936  }
  0x25   : > { %v628_v6 = vld [vmem:[%s626_s28] sm:$0x77]  ;;  %v1949_v58 = vld [vmem:[%s2642_s5 + $0x8] sm:$0xff]  ;;  %s2136_s1 = smov 96   ;;  %s1678_s23 = sshll.u32 %s621_s29, 4  ;;  %s1679_s23 = int_to_ptr.vmem [resolvable:$true] %s1678_s23 }
  0x26   : > { %737 = vmatpush.bf16.msra.mxu0 %v1942_v2  ;;  %v656_v8 = vunpack.c.h.b16 %v628_v6  ;;  %v655_v14 = vunpack.c.l.b16 %v628_v6  ;;  %v1936_v15 = vld [vmem:[%s2637_s21] sm:$0xff]  ;;  %886 = vmatpush.bf16.msra.mxu2 %v1949_v58  ;;  %s1668_s30 = scalar_lea.sflag [#allocation3], %s620_s27 }
  0x27   : > { %754 = vmatpush.bf16.msra.mxu1 %v1946_v3  ;;  %v653_v19 = vld [vmem:[%s2639_s3] sm:$0x1f] }
  0x28   : > { %v658_v11 = vpack.c.b16 %v656_v8, %v656_v8  ;;  %v657_v16 = vpack.c.b16 %v655_v14, %v655_v14  ;;  %v2014_v46 = vld [vmem:[%s2640_s20] ss:$0 sm:$0xff] }
  0x29   : > { %v2033_v26 = vpop.eup %2032  ;;  %v1948_v59 = vld [vmem:[%s2642_s5] sm:$0xff] }
  0x2a   : > { %738 = vmatpush.bf16.msra.mxu0 %v1941_v4  ;;  %v769_v27 = vmul.f32 32.0, %v2033_v26  ;;  %vm773_vm2 = vweird.f32 %v2033_v26  ;;  %v2015_v49 = vld [vmem:[%s2641_s4] ss:$0 sm:$0xff]  ;;  %887 = vmatpush.bf16.msra.mxu2 %v1948_v59  ;;  %s2137_s4 = smov 64  }
  0x2b   : > { %755 = vmatpush.bf16.msra.mxu1 %v1945_v5  ;;  %v2016_v5 = vld [vmem:[%s2597_s9] ss:$0 sm:$0xff] }
  0x2c   : > { %v770_v28 = vsub.f32 1.0, %v769_v27  ;;  %v2017_v8 = vld [vmem:[%s2598_s10] ss:$0 sm:$0xff] }
  0x2e   : > { %739 = vmatpush.bf16.msra.mxu0 %v1940_v7  ;;  %v771_v29 = vmul.f32 %v2033_v26, %v770_v28 }
  0x2f   : > { %756 = vmatpush.bf16.msra.mxu1 %v1944_v9 }
  0x30   : > { %v772_v30 = vadd.f32 %v2033_v26, %v771_v29 }
  0x32   : > { %740 = vmatpush.bf16.msra.mxu0 %v1939_v10  ;;  %1789 = vmatmul.msk.bf16.vlgmr.msra.gmra.mxu1 %vm732_vm0, %v658_v11  ;;  %v2338_v31 = vsel %vm773_vm2, %v2033_v26, %v772_v30 }
  0x36   : > { %741 = vmatpush.bf16.msra.mxu0 %v1938_v12  ;;  %v2018_v12 = vld [vmem:[%s2643_s6] ss:$0 sm:$0xff] }
  0x3a   : > { %742 = vmatpush.bf16.msra.mxu0 %v1937_v13 }
  0x3e   : > { %743 = vmatpush.bf16.msra.mxu0 %v1936_v15 }
  0x41   : > { %744 = vmatmul.bf16.vlgmr.msra.gmra.mxu0 %v657_v16 }
  0xaf   : > { %v758_v17 = vpop.f32.mrf.mxu1 }
  0xb7   : > { %v760_v18 = vpop.f32.mrf.mxu1 }
  0xbe   : > { %v745_v20 = vpop.f32.mrf.mxu0 }
  0xbf   : > { %v746_v21 = vadd.f32 %v745_v20, %v653_v19 }
  0xc1   : > { %v759_v22 = vadd.f32 %v758_v17, %v746_v21 }
  0xc3   : > { %v765_v23 = vsel %vm764_vm1, %v759_v22, 0.0 }
  0xc4   : > { %766 = vadd.xlane.f32.xlu0 %v765_v23 }
  0xc6   : > { %v747_v24 = vpop.f32.mrf.mxu0 }
 0x137   : > { %v767_v32 = vpop.xlane.xlu0 %766 }
 0x138   : > { %v775_v33 = vmul.f32 %v2338_v31, %v767_v32 }
 0x13a   : > { %v776_v34 = vsub.f32 %v759_v22, %v775_v33 }
 0x13c   : > { %v777_v35 = vmul.f32 %v776_v34, %v776_v34 }
 0x13e   : > { %v778_v36 = vsel %vm764_vm1, %v777_v35, 0.0 }
 0x13f   : > { %779 = vadd.xlane.f32.xlu0 %v778_v36 }
 0x1b2   : > { %v780_v37 = vpop.xlane.xlu0 %779 }
 0x1b3   : > { %v781_v38 = vmul.f32 %v780_v37, %v2338_v31 }
 0x1b5   : > { %v782_v39 = vadd.f32 1e-05, %v781_v38 }
 0x1b7   : > { %2034 = vrsqrt.f32 %v782_v39  ;;  %vm789_vm4 = vweird.f32 %v782_v39 }
 0x1bd   : > { %v2035_v40 = vpop.eup %2034 }
 0x1be   : > { %v784_v41 = vmul.f32 %v2035_v40, %v782_v39  ;;  %vm790_vm3 = vweird.f32 %v2035_v40 }
 0x1bf   : > { %vm791_vm5 = vmor %vm789_vm4, %vm790_vm3 }
 0x1c0   : > { %v785_v42 = vmul.f32 %v2035_v40, %v784_v41 }
 0x1c2   : > { %v786_v43 = vmul.f32 0.5, %v785_v42 }
 0x1c4   : > { %v787_v44 = vsub.f32 1.5, %v786_v43 }
 0x1c6   : > { %v788_v45 = vmul.f32 %v2035_v40, %v787_v44  ;;  %v1951_v44 = vld [vmem:[%s2595_s7 + $0x8] sm:$0xff] }
 0x1c8   : > { %v792_v47 = vsel %vm791_vm5, %v2035_v40, %v788_v45 }
 0x1c9   : > { %v793_v48 = vmul.f32 %v792_v47, %v776_v34 }
 0x1cb   : > { %v797_v50 = vmul.f32 %v2014_v46, %v793_v48  ;;  %v1950_v46 = vld [vmem:[%s2595_s7] sm:$0xff] }
 0x1cd   : > { %v2349_v51 = vadd.f32 %v2015_v49, %v797_v50 }
 0x1cf   : > { %v830_v52 = vsel %vm764_vm1, %v2349_v51, 0.0 }
 0x1d0   : > { %831 = vadd.xlane.f32.xlu1 %v830_v52  ;;  %v2019_v52 = vld [vmem:[%s2596_s8] ss:$0 sm:$0xff] }
 0x243   : > { %v832_v53 = vpop.xlane.xlu1 %831 }
 0x244   : > { %v833_v54 = vmul.f32 %v832_v53, %v2338_v31 }
 0x246   : > { %v834_v55 = vsub.f32 %v2349_v51, %v833_v54 }
 0x248   : > { %v835_v56 = vmul.f32 %v834_v55, %v834_v55 }
 0x24a   : > { %v836_v57 = vsel %vm764_vm1, %v835_v56, 0.0 }
 0x24b   : > { %837 = vadd.xlane.f32.xlu1 %v836_v57 }
 0x2be   : > { %v838_v60 = vpop.xlane.xlu1 %837 }
 0x2bf   : > { %v839_v61 = vmul.f32 %v838_v60, %v2338_v31 }
 0x2c1   : > { %v840_v62 = vadd.f32 1e-05, %v839_v61 }
 0x2c3   : > { %2036 = vrsqrt.f32 %v840_v62  ;;  %vm847_vm7 = vweird.f32 %v840_v62 }
 0x2c9   : > { %v2037_v63 = vpop.eup %2036 }
 0x2ca   : > { %v842_v0 = vmul.f32 %v2037_v63, %v840_v62  ;;  %vm848_vm6 = vweird.f32 %v2037_v63 }
 0x2cb   : > { %vm849_vm8 = vmor %vm847_vm7, %vm848_vm6 }
 0x2cc   : > { %v843_v1 = vmul.f32 %v2037_v63, %v842_v0 }
 0x2ce   : > { %v844_v2 = vmul.f32 0.5, %v843_v1 }
 0x2d0   : > { %v845_v3 = vsub.f32 1.5, %v844_v2 }
 0x2d2   : > { %v846_v4 = vmul.f32 %v2037_v63, %v845_v3 }
 0x2d4   : > { %v850_v6 = vsel %vm849_vm8, %v2037_v63, %v846_v4  ;;  %v1952_v63 = vld [vmem:[%s2601_s13] sm:$0xff] }
 0x2d5   : > { %v851_v7 = vmul.f32 %v850_v6, %v834_v55 }
 0x2d7   : > { %v855_v9 = vmul.f32 %v2016_v5, %v851_v7 }
 0x2d9   : > { %v859_v10 = vadd.f32 %v2017_v8, %v855_v9  ;;  %v2020_v9 = vld [vmem:[%s2599_s11] ss:$0 sm:$0xff] }
 0x2db   : > { %v860_v11 = vpack.c.bf16 %v859_v10, %v859_v10 }
 0x2dd   : > { %1798 = vmatmul.msk.bf16.vlgmr.msra.gmra.mxu2 %vm876_vm9, %v860_v11 }
 0x360   : > { %v889_v13 = vpop.f32.mrf.mxu2 }
 0x361   : > { %v890_v14 = vadd.f32 %v2018_v12, %v889_v13  ;;  %v2021_v12 = vld [vmem:[%s2600_s12] ss:$0 sm:$0xff] }
 0x363   : > { %898 = vrot.lane.b32.xlu2 %v890_v14, %s2135_s24  ;;  %v893_v15 = vmul.f32 0.25, %v890_v14 }
 0x365   : > { %895 = vrot.lane.b32.xlu1 %v893_v15, %s2135_s24 }
 0x368   : > { %v891_v16 = vpop.f32.mrf.mxu2 }
 0x369   : > { %v1957_v16 = vld [vmem:[%s2603_s15 + $0x18] sm:$0xff] }
 0x36b   : > { %900 = vrot.lane.b32.xlu2 %v890_v14, %s2136_s1 }
 0x3bd   : > { %v899_v17 = vpop.permute.xlu2 %898 }
 0x3be   : > { %927 = vrot.lane.b32.xlu0 %v899_v17, %s2136_s1 }
 0x3c5   : > { %v901_v18 = vpop.permute.xlu2 %900 }
 0x3c6   : > { %1799 = vmatpush.xpose.msk.msra.mxu3 %vm902_vm10, %v901_v18  ;;  %v1955_v18 = vld [vmem:[%s2603_s15 + $0x8] sm:$0xff] }
 0x3c9   : > { %1800 = vmatmul.msk.f32.vlgmr.msra.gmra.mxu3 %vm902_vm10, %v893_v15 }
 0x3d7   : > { %v896_v20 = vpop.permute.xlu1 %895 }
 0x430   : > { %v928_v19 = vpop.permute.xlu0 %927 }
 0x431   : > { %1801 = vmatpush.xpose.msk.msrb.mxu3 %vm902_vm10, %v928_v19  ;;  %v2022_v19 = vld [vmem:[%s2602_s14] ss:$0 sm:$0xff] }
 0x434   : > { %1802 = vmatmul.msk.f32.vlgmr.msrb.gmra.mxu3 %vm902_vm10, %v896_v20 }
 0x44c   : > { %v924_v21 = vpop.f32.mrf.mxu3 }
 0x44d   : > { %v954_v22 = vsel %vm953_vm11, %v924_v21, -inf }
 0x44e   : > { %955 = vmax.xlane.f32.xlu0 %v954_v22 }
 0x4b7   : > { %v950_v23 = vpop.f32.mrf.mxu3 }
 0x4b8   : > { %v957_v24 = vsel %vm953_vm11, %v950_v23, -inf }
 0x4b9   : > { %958 = vmax.xlane.f32.xlu2 %v957_v24 }
 0x4c1   : > { %v956_v25 = vpop.xlane.xlu0 %955 }
 0x4c2   : > { %v960_v26 = vsub.f32 %v924_v21, %v956_v25  ;;  %v1954_v21 = vld [vmem:[%s2603_s15] sm:$0xff] }
 0x4c4   : > { %v962_v27 = vmul.f32 1.442695, %v960_v26 }
 0x4c6   : > { %2038 = vpow2.f32 %v962_v27 }
 0x4cc   : > { %v2039_v28 = vpop.eup %2038 }
 0x4cd   : > { %v966_v29 = vsel %vm953_vm11, %v2039_v28, 0.0 }
 0x4ce   : > { %967 = vadd.xlane.f32.xlu0 %v966_v29 }
 0x4d1   : > { %1005 = vrot.lane.b32.xlu2 %v899_v17, %s2137_s4  ;;  %v1956_v17 = vld [vmem:[%s2603_s15 + $0x10] sm:$0xff] }
 0x4d9   : > { %976 = vrot.lane.b32.xlu2 %v890_v14, %s2137_s4 }
 0x52c   : > { %v959_v30 = vpop.xlane.xlu2 %958 }
 0x52d   : > { %v961_v32 = vsub.f32 %v950_v23, %v959_v30 }
 0x52f   : > { %v964_v33 = vmul.f32 1.442695, %v961_v32 }
 0x531   : > { %2040 = vpow2.f32 %v964_v33 }
 0x534   : > { %v1006_v34 = vpop.permute.xlu2 %1005 }
 0x535   : > { %1805 = vmatpush.msk.msrb.mxu2 %vm982_vm12, %v1006_v34 }
 0x537   : > { %v2041_v35 = vpop.eup %2040  ;;  %1186 = vmatpush.bf16.msra.mxu2 %v1957_v16 }
 0x538   : > { %v969_v36 = vsel %vm953_vm11, %v2041_v35, 0.0 }
 0x539   : > { %970 = vadd.xlane.f32.xlu1 %v969_v36 }
 0x53b   : > { %1187 = vmatpush.bf16.msra.mxu2 %v1956_v17 }
 0x53c   : > { %v977_v37 = vpop.permute.xlu2 %976 }
 0x53d   : > { %1803 = vmatpush.msk.msra.mxu3 %vm982_vm12, %v977_v37 }
 0x53f   : > { %1059 = vmatpush.bf16.msrb.mxu3 %v1951_v44  ;;  %1188 = vmatpush.bf16.msra.mxu2 %v1955_v18 }
 0x541   : > { %v968_v38 = vpop.xlane.xlu0 %967 }
 0x542   : > { %2042 = vrcp.f32 %v968_v38 }
 0x543   : > { %1060 = vmatpush.bf16.msrb.mxu3 %v1950_v46  ;;  %1189 = vmatpush.bf16.msra.mxu2 %v1954_v21 }
 0x548   : > { %v2043_v39 = vpop.eup %2042 }
 0x549   : > { %v974_v40 = vmul.f32 %v2043_v39, %v2039_v28 }
 0x54b   : > { %1804 = vmatmul.msk.f32.vlgmr.msra.gmra.mxu3 %vm978_vm13, %v974_v40 }
 0x5ac   : > { %v971_v41 = vpop.xlane.xlu1 %970 }
 0x5ad   : > { %2044 = vrcp.f32 %v971_v41  ;;  %v2023_v41 = vld [vmem:[%s2604_s16] ss:$0 sm:$0xff] }
 0x5b3   : > { %v2045_v42 = vpop.eup %2044 }
 0x5b4   : > { %v975_v43 = vmul.f32 %v2045_v42, %v2041_v35 }
 0x5b6   : > { %1806 = vmatmul.msk.f32.vlgmr.msrb.gmra.mxu2 %vm978_vm13, %v975_v43 }
 0x5ce   : > { %v1002_v47 = vpop.f32.mrf.mxu3 }
 0x639   : > { %v1029_v45 = vpop.f32.mrf.mxu2 }
 0x63a   : > { %1033 = vrot.lane.b32.xlu1 %v1029_v45, %s2619_s25 }
 0x6ac   : > { %v1034_v48 = vpop.permute.xlu1 %1033 }
 0x6ad   : > { %v1036_v49 = vsel %vm902_vm10, %v1002_v47, %v1034_v48 }
 0x6ae   : > { %v1037_v50 = vpack.c.bf16 %v1036_v49, %v1036_v49 }
 0x6b0   : > { %1815 = vmatmul.msk.bf16.vlgmr.msrb.gmra.mxu3 %vm876_vm9, %v1037_v50 }
 0x733   : > { %v1062_v53 = vpop.f32.mrf.mxu3 }
 0x734   : > { %v1066_v54 = vadd.f32 %v1062_v53, %v2349_v51  ;;  %v1953_v51 = vld [vmem:[%s2601_s13 + $0x8] sm:$0xff]  ;;  %v1959_v53 = vld [vmem:[%s2642_s5 + $0x18] sm:$0xff] }
 0x735   : > { %1126 = vmatpush.bf16.msrb.mxu1 %v1953_v51  ;;  %1295 = vmatpush.bf16.msra.mxu3 %v1959_v53 }
 0x736   : > { %v2404_v55 = vadd.f32 %v2019_v52, %v1066_v54  ;;  %v1958_v54 = vld [vmem:[%s2642_s5 + $0x10] sm:$0xff] }
 0x738   : > { %v1071_v56 = vsel %vm764_vm1, %v2404_v55, 0.0 }
 0x739   : > { %1072 = vadd.xlane.f32.xlu0 %v1071_v56  ;;  %1127 = vmatpush.bf16.msrb.mxu1 %v1952_v63  ;;  %v2024_v63 = vld [vmem:[%s2597_s9 + $0x1] ss:$0 sm:$0xff] }
 0x73a   : > { %1296 = vmatpush.bf16.msra.mxu3 %v1958_v54 }
 0x73b   : > { %v1064_v57 = vpop.f32.mrf.mxu3 }
 0x7ac   : > { %v1073_v58 = vpop.xlane.xlu0 %1072 }
 0x7ad   : > { %v1074_v59 = vmul.f32 %v1073_v58, %v2338_v31 }
 0x7af   : > { %v1075_v60 = vsub.f32 %v2404_v55, %v1074_v59 }
 0x7b1   : > { %v1076_v61 = vmul.f32 %v1075_v60, %v1075_v60 }
 0x7b3   : > { %v1077_v62 = vsel %vm764_vm1, %v1076_v61, 0.0 }
 0x7b4   : > { %1078 = vadd.xlane.f32.xlu2 %v1077_v62 }
 0x827   : > { %v1079_v0 = vpop.xlane.xlu2 %1078 }
 0x828   : > { %v1080_v1 = vmul.f32 %v1079_v0, %v2338_v31 }
 0x82a   : > { %v1081_v2 = vadd.f32 1e-05, %v1080_v1 }
 0x82c   : > { %2046 = vrsqrt.f32 %v1081_v2  ;;  %vm1088_vm15 = vweird.f32 %v1081_v2 }
 0x832   : > { %v2047_v3 = vpop.eup %2046 }
 0x833   : > { %v1083_v4 = vmul.f32 %v2047_v3, %v1081_v2  ;;  %vm1089_vm14 = vweird.f32 %v2047_v3  ;;  %v2025_v2 = vld [vmem:[%s2598_s10 + $0x1] ss:$0 sm:$0xff] }
 0x834   : > { %vm1090_vm2 = vmor %vm1088_vm15, %vm1089_vm14 }
 0x835   : > { %v1084_v5 = vmul.f32 %v2047_v3, %v1083_v4 }
 0x837   : > { %v1085_v6 = vmul.f32 0.5, %v1084_v5 }
 0x839   : > { %v1086_v7 = vsub.f32 1.5, %v1085_v6  ;;  %v2026_v6 = vld [vmem:[%s2643_s6 + $0x1] ss:$0 sm:$0xff] }
 0x83b   : > { %v1087_v8 = vmul.f32 %v2047_v3, %v1086_v7 }
 0x83d   : > { %v1091_v10 = vsel %vm1090_vm2, %v2047_v3, %v1087_v8 }
 0x83e   : > { %v1092_v11 = vmul.f32 %v1091_v10, %v1075_v60 }
 0x840   : > { %v1096_v13 = vmul.f32 %v2020_v9, %v1092_v11 }
 0x842   : > { %v1100_v14 = vadd.f32 %v2021_v12, %v1096_v13 }
 0x844   : > { %v1101_v15 = vpack.c.bf16 %v1100_v14, %v1100_v14 }
 0x846   : > { %1824 = vmatmul.msk.bf16.vlgmr.msrb.gmra.mxu1 %vm876_vm9, %v1101_v15 }
 0x8c3   : > { %v1129_v20 = vpop.f32.mrf.mxu1 }
 0x8c4   : > { %v1130_v22 = vadd.f32 %v2022_v19, %v1129_v20 }
 0x8c6   : > { %v1825_v23 = vmul.f32 -1.702, %v1130_v22 }
 0x8c8   : > { %v1135_v24 = vmul.f32 1.442695, %v1825_v23 }
 0x8ca   : > { %2048 = vpow2.f32 %v1135_v24 }
 0x8cb   : > { %v1131_v25 = vpop.f32.mrf.mxu1 }
 0x8d0   : > { %v2049_v26 = vpop.eup %2048 }
 0x8d1   : > { %v1137_v27 = vadd.f32 1.0, %v2049_v26 }
 0x8d3   : > { %2050 = vrcp.f32 %v1137_v27  ;;  %v1149_v32 = vand.u32 2147483648, %v1137_v27  ;;  %v1147_v34 = vand.u32 2147483647, %v1137_v27  ;;  %vm1143_vm4 = vweird.f32 %v1137_v27 }
 0x8d5   : > { %v1150_v36 = vor.u32 1.1754944e-38, %v1149_v32  ;;  %vm1148_vm6 = vcmp.eq.f32.partialorder %v1147_v34, 8.507059e+37 }
 0x8d9   : > { %v2051_v28 = vpop.eup %2050 }
 0x8da   : > { %v1139_v29 = vmul.f32 %v2051_v28, %v1137_v27  ;;  %vm1144_vm3 = vweird.f32 %v2051_v28 }
 0x8db   : > { %vm1145_vm5 = vmor %vm1143_vm4, %vm1144_vm3  ;;  %vm1607_vm3 = vcmask 253952  }
 0x8dc   : > { %v1140_v30 = vsub.f32 1.0, %v1139_v29 }
 0x8de   : > { %v1141_v33 = vmul.f32 %v2051_v28, %v1140_v30 }
 0x8e0   : > { %v1142_v35 = vadd.f32 %v2051_v28, %v1141_v33 }
 0x8e2   : > { %v1146_v37 = vsel %vm1145_vm5, %v2051_v28, %v1142_v35 }
 0x8e3   : > { %v1151_v38 = vsel %vm1148_vm6, %v1150_v36, %v1146_v37  ;;  %vm1665_vm6 = vcmask 122880  }
 0x8e4   : > { %v1153_v39 = vmul.f32 %v1151_v38, %v1130_v22  ;;  %v1961_v38 = vld [vmem:[%s2595_s7 + $0x18] sm:$0xff] }
 0x8e6   : > { %v1154_v40 = vpack.c.bf16 %v1153_v39, %v1153_v39 }
 0x8e8   : > { %1842 = vmatmul.msk.bf16.vlgmr.msra.gmra.mxu2 %vm732_vm0, %v1154_v40  ;;  %v1960_v40 = vld [vmem:[%s2595_s7 + $0x10] sm:$0xff] }
 0x96b   : > { %v1191_v42 = vpop.f32.mrf.mxu2 }
 0x96c   : > { %v1195_v43 = vadd.f32 %v1191_v42, %v2404_v55 }
 0x96e   : > { %v2445_v44 = vadd.f32 %v2023_v41, %v1195_v43 }
 0x970   : > { %v1240_v45 = vsel %vm764_vm1, %v2445_v44, 0.0 }
 0x971   : > { %1241 = vadd.xlane.f32.xlu0 %v1240_v45 }
 0x973   : > { %v1193_v46 = vpop.f32.mrf.mxu2 }
 0x974   : > { %v2027_v46 = vld [vmem:[%s2596_s8 + $0x1] ss:$0 sm:$0xff] }
 0x9e4   : > { %v1242_v47 = vpop.xlane.xlu0 %1241 }
 0x9e5   : > { %v1243_v48 = vmul.f32 %v1242_v47, %v2338_v31 }
 0x9e7   : > { %v1244_v49 = vsub.f32 %v2445_v44, %v1243_v48 }
 0x9e9   : > { %v1245_v50 = vmul.f32 %v1244_v49, %v1244_v49 }
 0x9eb   : > { %v1246_v52 = vsel %vm764_vm1, %v1245_v50, 0.0 }
 0x9ec   : > { %1247 = vadd.xlane.f32.xlu0 %v1246_v52 }
 0xa5f   : > { %v1248_v55 = vpop.xlane.xlu0 %1247 }
 0xa60   : > { %v1249_v56 = vmul.f32 %v1248_v55, %v2338_v31 }
 0xa62   : > { %v1250_v57 = vadd.f32 1e-05, %v1249_v56 }
 0xa64   : > { %2052 = vrsqrt.f32 %v1250_v57  ;;  %vm1257_vm8 = vweird.f32 %v1250_v57 }
 0xa6a   : > { %v2053_v58 = vpop.eup %2052 }
 0xa6b   : > { %v1252_v59 = vmul.f32 %v2053_v58, %v1250_v57  ;;  %vm1258_vm7 = vweird.f32 %v2053_v58 }
 0xa6c   : > { %vm1259_vm14 = vmor %vm1257_vm8, %vm1258_vm7 }
 0xa6d   : > { %v1253_v60 = vmul.f32 %v2053_v58, %v1252_v59 }
 0xa6f   : > { %v1254_v61 = vmul.f32 0.5, %v1253_v60 }
 0xa71   : > { %v1255_v62 = vsub.f32 1.5, %v1254_v61 }
 0xa73   : > { %v1256_v51 = vmul.f32 %v2053_v58, %v1255_v62 }
 0xa75   : > { %v1260_v0 = vsel %vm1259_vm14, %v2053_v58, %v1256_v51  ;;  %v1962_v58 = vld [vmem:[%s2601_s13 + $0x10] sm:$0xff] }
 0xa76   : > { %v1261_v1 = vmul.f32 %v1260_v0, %v1244_v49 }
 0xa78   : > { %v1265_v3 = vmul.f32 %v2024_v63, %v1261_v1 }
 0xa7a   : > { %v1269_v4 = vadd.f32 %v2025_v2, %v1265_v3  ;;  %v2028_v3 = vld [vmem:[%s2599_s11 + $0x1] ss:$0 sm:$0xff] }
 0xa7c   : > { %v1270_v5 = vpack.c.bf16 %v1269_v4, %v1269_v4 }
 0xa7e   : > { %1879 = vmatmul.msk.bf16.vlgmr.msra.gmra.mxu3 %vm876_vm9, %v1270_v5 }
 0xb01   : > { %v1298_v7 = vpop.f32.mrf.mxu3 }
 0xb02   : > { %v1299_v8 = vadd.f32 %v2026_v6, %v1298_v7  ;;  %v2029_v6 = vld [vmem:[%s2600_s12 + $0x1] ss:$0 sm:$0xff] }
 0xb04   : > { %1307 = vrot.lane.b32.xlu1 %v1299_v8, %s2135_s24  ;;  %v1302_v10 = vmul.f32 0.25, %v1299_v8 }
 0xb09   : > { %v1300_v9 = vpop.f32.mrf.mxu3 }
 0xb0c   : > { %1304 = vrot.lane.b32.xlu1 %v1302_v10, %s2135_s24  ;;  %s2646_s24 = sld [smem:[#allocation19_spill]] }
 0xb14   : > { %1309 = vrot.lane.b32.xlu1 %v1299_v8, %s2136_s1 }
 0xb76   : > { %v1308_v11 = vpop.permute.xlu1 %1307 }
 0xb77   : > { %1335 = vrot.lane.b32.xlu0 %v1308_v11, %s2136_s1  ;;  %s1676_s1 = scalar_lea.hbm %s2646_s24, %s2265_s2 }
 0xb78   : > { %s1680_s20 = sshll.u32 %s1676_s1, 4  ;;  %s1681_s20 = int_to_ptr.hbm [resolvable:$true] %s1680_s20 }
 0xb79   : > { %s2084_s0 = sshra.s32 %s1681_s20, 4  ;;  %s2085_s0 = int_to_ptr.hbm [resolvable:$true] %s2084_s0 }
 0xb7a   : > { %s2086_s26 = scalar_lea.hbm %s2085_s0, 1 }
 0xb7b   : > { %p2087_p11 = scmp.ne.s32.totalorder %s2085_s0, %s2086_s26 }
 0xb7d   : > { %p2088_p12 = pnand %p2087_p11, %p2282_p5 }
 0xb7e   : > { %v1305_v12 = vpop.permute.xlu1 %1304 }
 0xb7f   : > { %p2089_p13 = pneg %p2088_p12 }
 0xb86   : > { %v1310_v13 = vpop.permute.xlu1 %1309 }
 0xb87   : > { %1880 = vmatpush.xpose.msk.msrb.mxu2 %vm902_vm10, %v1310_v13  ;;  %v2030_v13 = vld [vmem:[%s2602_s14 + $0x1] ss:$0 sm:$0xff] }
 0xb8a   : > { %1881 = vmatmul.msk.f32.vlgmr.msrb.gmra.mxu2 %vm902_vm10, %v1302_v10  ;;  %v1967_v10 = vld [vmem:[%s2603_s15 + $0x38] sm:$0xff] }
 0xb8b   : > { %1464 = vmatpush.bf16.msra.mxu2 %v1961_v38 }
 0xb8f   : > { %1465 = vmatpush.bf16.msra.mxu2 %v1960_v40 }
 0xbe9   : > { %v1336_v14 = vpop.permute.xlu0 %1335 }
 0xbea   : > { %1882 = vmatpush.xpose.msk.msra.mxu1 %vm902_vm10, %v1336_v14 }
 0xbed   : > { %1883 = vmatmul.msk.f32.vlgmr.msra.gmra.mxu1 %vm902_vm10, %v1305_v12  ;;  %v1965_v12 = vld [vmem:[%s2603_s15 + $0x28] sm:$0xff] }
 0xc0d   : > { %v1332_v15 = vpop.f32.mrf.mxu2 }
 0xc0e   : > { %v1361_v16 = vsel %vm953_vm11, %v1332_v15, -inf }
 0xc0f   : > { %1362 = vmax.xlane.f32.xlu2 %v1361_v16 }
 0xc27   : > { %1410 = vrot.lane.b32.xlu2 %v1308_v11, %s2137_s4  ;;  %v1966_v11 = vld [vmem:[%s2603_s15 + $0x30] sm:$0xff] }
 0xc6a   : > { %v1358_v17 = vpop.f32.mrf.mxu1 }
 0xc6b   : > { %v1364_v18 = vsel %vm953_vm11, %v1358_v17, -inf }
 0xc6c   : > { %1365 = vmax.xlane.f32.xlu0 %v1364_v18 }
 0xc80   : > { %1383 = vrot.lane.b32.xlu0 %v1299_v8, %s2137_s4  ;;  %s2644_s4 = smov 16  }
 0xc82   : > { %v1363_v19 = vpop.xlane.xlu2 %1362 }
 0xc83   : > { %v1367_v20 = vsub.f32 %v1332_v15, %v1363_v19  ;;  %v1964_v15 = vld [vmem:[%s2603_s15 + $0x20] sm:$0xff] }
 0xc85   : > { %v1369_v21 = vmul.f32 1.442695, %v1367_v20 }
 0xc87   : > { %2054 = vpow2.f32 %v1369_v21 }
 0xc8a   : > { %v1411_v22 = vpop.permute.xlu2 %1410 }
 0xc8b   : > { %1886 = vmatpush.msk.msrb.mxu1 %vm982_vm12, %v1411_v22 }
 0xc8d   : > { %v2055_v23 = vpop.eup %2054 }
 0xc8e   : > { %v1373_v24 = vsel %vm953_vm11, %v2055_v23, 0.0 }
 0xc8f   : > { %1374 = vadd.xlane.f32.xlu2 %v1373_v24 }
 0xcdf   : > { %v1366_v25 = vpop.xlane.xlu0 %1365 }
 0xce0   : > { %v1368_v26 = vsub.f32 %v1358_v17, %v1366_v25 }
 0xce2   : > { %v1371_v27 = vmul.f32 1.442695, %v1368_v26 }
 0xce4   : > { %2056 = vpow2.f32 %v1371_v27 }
 0xcea   : > { %v2057_v28 = vpop.eup %2056 }
 0xceb   : > { %v1376_v29 = vsel %vm953_vm11, %v2057_v28, 0.0 }
 0xcec   : > { %1377 = vadd.xlane.f32.xlu1 %v1376_v29 }
 0xcf2   : > { %v1384_v30 = vpop.permute.xlu0 %1383 }
 0xcf3   : > { %1884 = vmatpush.msk.msrb.mxu0 %vm982_vm12, %v1384_v30 }
 0xcf5   : > { %1591 = vmatpush.bf16.msra.mxu0 %v1967_v10 }
 0xcf9   : > { %1592 = vmatpush.bf16.msra.mxu0 %v1966_v11 }
 0xcfd   : > { %1593 = vmatpush.bf16.msra.mxu0 %v1965_v12 }
 0xd01   : > { %1594 = vmatpush.bf16.msra.mxu0 %v1964_v15 }
 0xd02   : > { %v1375_v32 = vpop.xlane.xlu2 %1374 }
 0xd03   : > { %2058 = vrcp.f32 %v1375_v32 }
 0xd09   : > { %v2059_v33 = vpop.eup %2058 }
 0xd0a   : > { %v1381_v34 = vmul.f32 %v2059_v33, %v2055_v23 }
 0xd0c   : > { %1885 = vmatmul.msk.f32.vlgmr.msrb.gmra.mxu0 %vm978_vm13, %v1381_v34 }
 0xd5f   : > { %v1378_v35 = vpop.xlane.xlu1 %1377 }
 0xd60   : > { %2060 = vrcp.f32 %v1378_v35  ;;  %v2031_v35 = vld [vmem:[%s2604_s16 + $0x1] ss:$0 sm:$0xff] }
 0xd66   : > { %v2061_v36 = vpop.eup %2060 }
 0xd67   : > { %v1382_v37 = vmul.f32 %v2061_v36, %v2057_v28 }
 0xd69   : > { %1887 = vmatmul.msk.f32.vlgmr.msrb.gmra.mxu1 %vm978_vm13, %v1382_v37 }
 0xd89   : > { %v1407_v41 = vpop.f32.mrf.mxu0 }
 0xde6   : > { %v1434_v39 = vpop.f32.mrf.mxu1 }
 0xde7   : > { %1438 = vrot.lane.b32.xlu1 %v1434_v39, %s2644_s4  ;;  %s2647_s4 = smov %s2646_s24 }
 0xde8   : > { %s2090_s2 = scalar_lea.hbm %s2647_s4, 2  ;;  %p2091_p0 = scmp.lt.s32.totalorder %s2085_s0, %s2647_s4 }
 0xde9   : > { %p2092_p1 = scmp.lt.s32.totalorder %s2090_s2, %s2086_s26 }
 0xdeb   : > { %p2093_p2 = por %p2092_p1, %p2091_p0 }
 0xded   : > { %p2094_p3 = pnand %p2093_p2, %p2089_p13 }
 0xe59   : > { %v1439_v42 = vpop.permute.xlu1 %1438 }
 0xe5a   : > { %v1441_v43 = vsel %vm902_vm10, %v1407_v41, %v1439_v42 }
 0xe5b   : > { %v1442_v45 = vpack.c.bf16 %v1441_v43, %v1441_v43 }
 0xe5d   : > { %1896 = vmatmul.msk.bf16.vlgmr.msra.gmra.mxu2 %vm876_vm9, %v1442_v45 }
 0xee0   : > { %v1467_v47 = vpop.f32.mrf.mxu2 }
 0xee1   : > { %v1471_v48 = vadd.f32 %v1467_v47, %v2445_v44  ;;  %v1963_v44 = vld [vmem:[%s2601_s13 + $0x18] sm:$0xff]  ;;  %v1969_v47 = vld [vmem:[%s2607_s19 + $0x8] sm:$0xff] }
 0xee2   : > { %1531 = vmatpush.bf16.msrb.mxu3 %v1963_v44  ;;  %1658 = vmatpush.bf16.msra.mxu1 %v1969_v47 }
 0xee3   : > { %v2500_v49 = vadd.f32 %v2027_v46, %v1471_v48  ;;  %v1968_v48 = vld [vmem:[%s2607_s19] sm:$0xff] }
 0xee5   : > { %v1476_v50 = vsel %vm764_vm1, %v2500_v49, 0.0 }
 0xee6   : > { %1477 = vadd.xlane.f32.xlu0 %v1476_v50  ;;  %1532 = vmatpush.bf16.msrb.mxu3 %v1962_v58  ;;  %v1605_v58 = vld [vmem:[%s2605_s17] sm:$0x1] }
 0xee7   : > { %1659 = vmatpush.bf16.msra.mxu1 %v1968_v48 }
 0xee8   : > { %v1469_v52 = vpop.f32.mrf.mxu2 }
 0xf59   : > { %v1478_v53 = vpop.xlane.xlu0 %1477 }
 0xf5a   : > { %v1479_v54 = vmul.f32 %v1478_v53, %v2338_v31 }
 0xf5c   : > { %v1480_v55 = vsub.f32 %v2500_v49, %v1479_v54 }
 0xf5e   : > { %v1481_v56 = vmul.f32 %v1480_v55, %v1480_v55 }
 0xf60   : > { %v1482_v57 = vsel %vm764_vm1, %v1481_v56, 0.0 }
 0xf61   : > { %1483 = vadd.xlane.f32.xlu1 %v1482_v57 }
 0xfd4   : > { %v1484_v59 = vpop.xlane.xlu1 %1483 }
 0xfd5   : > { %v1485_v60 = vmul.f32 %v1484_v59, %v2338_v31 }
 0xfd7   : > { %v1486_v61 = vadd.f32 1e-05, %v1485_v60 }
 0xfd9   : > { %2062 = vrsqrt.f32 %v1486_v61  ;;  %vm1493_vm10 = vweird.f32 %v1486_v61 }
 0xfdf   : > { %v2063_v62 = vpop.eup %2062 }
 0xfe0   : > { %v1488_v51 = vmul.f32 %v2063_v62, %v1486_v61  ;;  %vm1494_vm1 = vweird.f32 %v2063_v62 }
 0xfe1   : > { %vm1495_vm11 = vmor %vm1493_vm10, %vm1494_vm1 }
 0xfe2   : > { %v1489_v63 = vmul.f32 %v2063_v62, %v1488_v51 }
 0xfe4   : > { %v1490_v0 = vmul.f32 0.5, %v1489_v63 }
 0xfe6   : > { %v1491_v1 = vsub.f32 1.5, %v1490_v0 }
 0xfe8   : > { %v1492_v2 = vmul.f32 %v2063_v62, %v1491_v1 }
 0xfea   : > { %v1496_v4 = vsel %vm1495_vm11, %v2063_v62, %v1492_v2 }
 0xfeb   : > { %v1497_v5 = vmul.f32 %v1496_v4, %v1480_v55 }
 0xfed   : > { %v1501_v7 = vmul.f32 %v2028_v3, %v1497_v5 }
 0xfef   : > { %v1505_v8 = vadd.f32 %v2029_v6, %v1501_v7 }
 0xff1   : > { %v1506_v9 = vpack.c.bf16 %v1505_v8, %v1505_v8 }
 0xff3   : > { %1905 = vmatmul.msk.bf16.vlgmr.msrb.gmra.mxu3 %vm876_vm9, %v1506_v9 }
0x1076   : > { %v1534_v14 = vpop.f32.mrf.mxu3 }
0x1077   : > { %v1535_v16 = vadd.f32 %v2030_v13, %v1534_v14 }
0x1079   : > { %v1906_v17 = vmul.f32 -1.702, %v1535_v16 }
0x107b   : > { %v1540_v18 = vmul.f32 1.442695, %v1906_v17 }
0x107d   : > { %2064 = vpow2.f32 %v1540_v18 }
0x107e   : > { %v1536_v19 = vpop.f32.mrf.mxu3 }
0x1083   : > { %v2065_v20 = vpop.eup %2064 }
0x1084   : > { %v1542_v21 = vadd.f32 1.0, %v2065_v20 }
0x1086   : > { %2066 = vrcp.f32 %v1542_v21  ;;  %v1554_v25 = vand.u32 2147483648, %v1542_v21  ;;  %v1552_v27 = vand.u32 2147483647, %v1542_v21  ;;  %vm1548_vm13 = vweird.f32 %v1542_v21 }
0x1088   : > { %v1555_v29 = vor.u32 1.1754944e-38, %v1554_v25  ;;  %vm1553_vm2 = vcmp.eq.f32.partialorder %v1552_v27, 8.507059e+37 }
0x108c   : > { %v2067_v22 = vpop.eup %2066 }
0x108d   : > { %v1544_v23 = vmul.f32 %v2067_v22, %v1542_v21  ;;  %vm1549_vm12 = vweird.f32 %v2067_v22 }
0x108e   : > { %vm1550_vm15 = vmor %vm1548_vm13, %vm1549_vm12 }
0x108f   : > { %v1545_v24 = vsub.f32 1.0, %v1544_v23 }
0x1091   : > { %v1546_v26 = vmul.f32 %v2067_v22, %v1545_v24 }
0x1093   : > { %v1547_v28 = vadd.f32 %v2067_v22, %v1546_v26 }
0x1095   : > { %v1551_v30 = vsel %vm1550_vm15, %v2067_v22, %v1547_v28 }
0x1096   : > { %v1556_v32 = vsel %vm1553_vm2, %v1555_v29, %v1551_v30 }
0x1097   : > { %v1558_v33 = vmul.f32 %v1556_v32, %v1535_v16 }
0x1099   : > { %v1559_v34 = vpack.c.bf16 %v1558_v33, %v1558_v33 }
0x109b   : > { %1923 = vmatmul.msk.bf16.vlgmr.msra.gmra.mxu0 %vm732_vm0, %v1559_v34 }
0x1118   : > { %v1596_v36 = vpop.f32.mrf.mxu0 }
0x1119   : > { %v1600_v37 = vadd.f32 %v1596_v36, %v2500_v49 }
0x111b   : > { %v1604_v38 = vadd.f32 %v2031_v35, %v1600_v37 }
0x111d   : > { %v1608_v39 = vsel %vm1607_vm3, %v1604_v38, 0.0 }
0x111e   : > { %1609 = vadd.xlane.f32.xlu2 %v1608_v39 }
0x1120   : > { %v1598_v40 = vpop.f32.mrf.mxu0 }
0x1191   : > { %v1610_v41 = vpop.xlane.xlu2 %1609 }
0x1192   : > { %v1611_v42 = vmul.f32 %v1610_v41, %v2338_v31 }
0x1194   : > { %v1612_v43 = vsub.f32 %v1604_v38, %v1611_v42 }
0x1196   : > { %v1613_v45 = vmul.f32 %v1612_v43, %v1612_v43 }
0x1198   : > { %v1614_v46 = vsel %vm1607_vm3, %v1613_v45, 0.0 }
0x1199   : > { %1615 = vadd.xlane.f32.xlu2 %v1614_v46 }
0x120c   : > { %v1616_v49 = vpop.xlane.xlu2 %1615 }
0x120d   : > { %v1617_v50 = vmul.f32 %v1616_v49, %v2338_v31  ;;  %v1606_v31 = vld [vmem:[%s2606_s18] sm:$0x1] }
0x120f   : > { %v1618_v52 = vadd.f32 1e-05, %v1617_v50 }
0x1211   : > { %2068 = vrsqrt.f32 %v1618_v52  ;;  %vm1625_vm4 = vweird.f32 %v1618_v52 }
0x1217   : > { %v2069_v53 = vpop.eup %2068 }
0x1218   : > { %v1620_v54 = vmul.f32 %v2069_v53, %v1618_v52  ;;  %vm1626_vm0 = vweird.f32 %v2069_v53 }
0x1219   : > { %vm1627_vm5 = vmor %vm1625_vm4, %vm1626_vm0 }
0x121a   : > { %v1621_v55 = vmul.f32 %v2069_v53, %v1620_v54 }
0x121c   : > { %v1622_v56 = vmul.f32 0.5, %v1621_v55 }
0x121e   : > { %v1623_v57 = vsub.f32 1.5, %v1622_v56 }
0x1220   : > { %v1624_v44 = vmul.f32 %v2069_v53, %v1623_v57 }
0x1222   : > { %v1628_v59 = vsel %vm1627_vm5, %v2069_v53, %v1624_v44 }
0x1223   : > { %v1629_v60 = vmul.f32 %v1628_v59, %v1612_v43 }
0x1225   : > { %v1630_v61 = vmul.f32 %v1629_v60, %v1605_v58 }
0x1227   : > { %v1631_v62 = vadd.f32 %v1630_v61, %v1606_v31 }
0x1229   : > { %v1632_v51 = vpack.c.bf16 %v1631_v62, %v1631_v62 }
0x122b   : > { %1932 = vmatmul.msk.bf16.vlgmr.msra.gmra.mxu1 %vm876_vm9, %v1632_v51 }
0x12a8   : > { %v1661_v63 = vpop.f32.mrf.mxu1 }
0x12a9   : > { %1666 = vst.msk [vmem:[%s621_s29] sm:$0x1] %vm1665_vm6, %v1661_v63 }
0x12aa   : > { %2097 = shalt.err (!%p2094_p3)
}
0x12ab   : > { %1970 = dma.vmem_to_hbm [thread:$0]  (%p2282_p5), %s1679_s23, 16, %s1681_s20, %s1668_s30  }
0x12b0   : > { %v1663_v0 = vpop.f32.mrf.mxu1 }
0x12b1 PF: > { %s2648_s27 = sld [smem:[#allocation7_spill]] }
0x12b2   : > { %s2649_s24 = sld [smem:[#allocation5_spill]] }
0x12b7   : > { %p1976_p4 = scmp.ge.s32.totalorder %s2648_s27, 2 }
0x12b8   : > { %s1692_s29 = sand.u32 1, %s2649_s24  }
0x12b9   : > { %p1973_p7 = pnand %p1976_p4, %p2286_p6  ;;  %s1693_s5 = scalar_lea.sflag [#allocation3], %s1692_s29 }
0x12bb   : > { %p1974_p8 = pneg %p1973_p7 }
0x12bd   : > { %2115 = dma.done.wait (%p1974_p8), %s1693_s5, 16  }
0x12be   : > { %2117 = vsyncadd (%p1974_p8), %s1693_s5, 4294967280  ;;  %s2651_s24 = sld [smem:[#allocation8_spill]]  ;;  %s2654_s1 = smov %s2124_s22 }
0x12bf   : > { %s2652_s6 = sld [smem:[#allocation6_spill]] }
0x12c0   : > { %s2653_s23 = sld [smem:[#allocation9_spill]] }
0x12c4   : > { %p30_p9 = scmp.ge.s32.totalorder %s2651_s24, 4  }
0x12c5   : > { %s2655_s22 = smov %s2652_s6 }
0x12c6   :  { %32 = sbr.rel (!%p30_p9) target bundleno = 12 (0xc), region = 147 }
0x12cb   :  { %1698 = vsyncpa [#allocation3], 1 }
0x12cc   :  { %1700 = vsyncpa [#allocation3 + $0x1], 1 }

</bundles_post_ra>
